<compile_context>
chip_gen: v5e
topology: v5e:2x2
jax: 0.10.0
libtpu: 0.0.40
codegen_flags: <defaults>
</compile_context>

<pallas_src>
import functools

import jax
import jax.numpy as jnp
from jax import lax
from jax.experimental import pallas as pl
from jax.experimental.pallas import tpu as pltpu

EPS = 1e-5


def _double_conv_kernel(x_ref, w1_ref, g1_ref, b1_ref, w2_ref, g2_ref, b2_ref,
                        p_ref, out_ref, xpad_ref, ypad_ref, *, H, W, cin, cout):
    # x_ref    : (N, H, W*cin)         bf16  unpadded input, channels-minor
    # w1_ref   : (9*W*cin,  W*cout)    bf16  block-diagonal im2col weights
    # w2_ref   : (9*W*cout, W*cout)    bf16
    # g*/b*    : (1, W*cout)           f32   BN gamma/beta tiled over W
    # p_ref    : (W*cout, W*cout)      f32   0/1 per-channel fold matrix
    # out_ref  : (N*H, W*cout)         f32   lane-dense output slab
    # xpad_ref : (N, H+2, (W+2)*cin)   f32   VMEM scratch (padded input)
    # ypad_ref : (N, H+2, (W+2)*cout)  f32   VMEM scratch (padded intermediate)
    N = x_ref.shape[0]
    NH = N * H
    inv_cnt = 1.0 / float(N * H * W)          # BN reduces over (N, H, W)
    p = p_ref[...]

    def fill_padded(pad_ref, interior, c):
        # Zero ONLY the 1-pixel halo (2 row strips + 2 column strips), then
        # write the interior once -- no full-buffer zero + full rewrite.
        wpc = (W + 2) * c
        pad_ref[:, 0:1, :] = jnp.zeros((N, 1, wpc), jnp.float32)
        pad_ref[:, H + 1:H + 2, :] = jnp.zeros((N, 1, wpc), jnp.float32)
        zcol = jnp.zeros((N, H, c), jnp.float32)
        pad_ref[:, 1:H + 1, 0:c] = zcol
        pad_ref[:, 1:H + 1, wpc - c:wpc] = zcol
        pad_ref[:, 1:H + 1, c:wpc - c] = interior

    def conv3x3(pad_ref, w_big, c):
        # im2col: concatenate the 9 shifted taps along the lane axis and do a
        # single bf16 MXU matmul (K = 9*W*c) that directly yields the
        # lane-dense (N*H, W*cout) layout.  Accumulation is f32.
        taps = []
        for dy in range(3):
            for dx in range(3):
                taps.append(
                    pad_ref[:, dy:dy + H, dx * c:dx * c + W * c].reshape(NH, W * c))
        patches = jnp.concatenate(taps, axis=-1).astype(jnp.bfloat16)
        return jnp.dot(patches, w_big, preferred_element_type=jnp.float32)

    def bn_relu(acc, g_t, b_t):
        # One-pass training-mode BN (biased variance) + ReLU, all lane-dense.
        col_s = jnp.sum(acc, axis=0, keepdims=True)            # (1, W*cout)
        col_sq = jnp.sum(acc * acc, axis=0, keepdims=True)     # (1, W*cout)
        mean_t = jnp.dot(col_s, p, preferred_element_type=jnp.float32) * inv_cnt
        msq_t = jnp.dot(col_sq, p, preferred_element_type=jnp.float32) * inv_cnt
        var_t = msq_t - mean_t * mean_t
        scale_t = g_t * lax.rsqrt(var_t + EPS)
        shift_t = b_t - mean_t * scale_t
        return jnp.maximum(acc * scale_t + shift_t, 0.0)

    # ---- conv1 -> BN1 -> ReLU ----
    fill_padded(xpad_ref, x_ref[...].astype(jnp.float32), cin)
    acc1 = conv3x3(xpad_ref, w1_ref[...], cin)                 # (N*H, W*cout)
    y1 = bn_relu(acc1, g1_ref[...], b1_ref[...])

    # ---- conv2 -> BN2 -> ReLU ----
    fill_padded(ypad_ref, y1.reshape(N, H, W * cout), cout)
    acc2 = conv3x3(ypad_ref, w2_ref[...], cout)
    out_ref[...] = bn_relu(acc2, g2_ref[...], b2_ref[...])


def _full(shape):
    nd = len(shape)
    return pl.BlockSpec(shape, lambda i, _nd=nd: (0,) * _nd)


@jax.jit
def double_conv(x_nchw, w1, g1, b1, w2, g2, b2):
    """x_nchw: (N, Cin, H, W) f32; w*: (3,3,Cin/out,Cout) HWIO.  Returns NCHW."""
    N, Cin, H, W = x_nchw.shape
    Cout = w1.shape[-1]
    WC = W * Cout

    # Channels-last, lane-friendly (N, H, W*Cin) layout; bf16 halves HBM bytes.
    # TODO(synk): accept NHWC at the API boundary to drop this transpose.
    x2d = jnp.transpose(x_nchw, (0, 2, 3, 1)).reshape(N, H, W * Cin)
    x2d = x2d.astype(jnp.bfloat16)

    # Block-diagonal im2col weights:
    #   W_big[t*W*Ci + w*Ci + i, v*Cout + c] = w[t, i, c] * (w == v)
    # so one matmul over the 9-tap patch slab produces (N*H, W*Cout) directly.
    eye_w = jnp.eye(W, dtype=jnp.float32)
    w1_big = jnp.einsum('wv,tic->twivc', eye_w, w1.reshape(9, Cin, Cout))
    w1_big = w1_big.reshape(9 * W * Cin, WC).astype(jnp.bfloat16)
    w2_big = jnp.einsum('wv,tic->twivc', eye_w, w2.reshape(9, Cout, Cout))
    w2_big = w2_big.reshape(9 * W * Cout, WC).astype(jnp.bfloat16)

    # 0/1 fold matrix (columns sharing a channel) and W-tiled gamma/beta.
    ch = jnp.arange(WC, dtype=jnp.int32) % Cout
    p = (ch[:, None] == ch[None, :]).astype(jnp.float32)       # (WC, WC)
    g1_t = jnp.tile(g1.reshape(1, Cout).astype(jnp.float32), (1, W))
    b1_t = jnp.tile(b1.reshape(1, Cout).astype(jnp.float32), (1, W))
    g2_t = jnp.tile(g2.reshape(1, Cout).astype(jnp.float32), (1, W))
    b2_t = jnp.tile(b2.reshape(1, Cout).astype(jnp.float32), (1, W))

    kernel = functools.partial(_double_conv_kernel, H=H, W=W, cin=Cin, cout=Cout)

    out2d = pl.pallas_call(
        kernel,
        out_shape=jax.ShapeDtypeStruct((N * H, WC), jnp.float32),
        grid=(1,),
        in_specs=[_full(x2d.shape),
                  _full(w1_big.shape), _full(g1_t.shape), _full(b1_t.shape),
                  _full(w2_big.shape), _full(g2_t.shape), _full(b2_t.shape),
                  _full(p.shape)],
        out_specs=_full((N * H, WC)),
        scratch_shapes=[pltpu.VMEM((N, H + 2, (W + 2) * Cin), jnp.float32),
                        pltpu.VMEM((N, H + 2, (W + 2) * Cout), jnp.float32)],
        compiler_params=pltpu.CompilerParams(dimension_semantics=("arbitrary",)),
    )(x2d, w1_big, g1_t, b1_t, w2_big, g2_t, b2_t, p)

    out = out2d.reshape(N, H, W, Cout)
    return jnp.transpose(out, (0, 3, 1, 2))   # TODO(synk): keep NHWC for real use


def reference(x_nchw, w1, g1, b1, w2, g2, b2):
    """Pure-JAX f32 reference matching PyTorch DoubleConv.forward (training BN)."""
    def conv(x, w):  # w: (3,3,Cin,Cout) HWIO -> OIHW
        w_oihw = jnp.transpose(w, (3, 2, 0, 1))
        return lax.conv_general_dilated(
            x, w_oihw, window_strides=(1, 1), padding=((1, 1), (1, 1)),
            dimension_numbers=('NCHW', 'OIHW', 'NCHW'))

    def bn_relu(y, g, b):
        mean = jnp.mean(y, axis=(0, 2, 3), keepdims=True)
        var = jnp.mean((y - mean) ** 2, axis=(0, 2, 3), keepdims=True)
        y = (y - mean) * lax.rsqrt(var + EPS)
        y = y * g.reshape(1, -1, 1, 1) + b.reshape(1, -1, 1, 1)
        return jnp.maximum(y, 0.0)

    y = bn_relu(conv(x_nchw, w1), g1, b1)
    return bn_relu(conv(y, w2), g2, b2)


if __name__ == "__main__":
    N, Cin, Cout, H, W = 2, 4, 8, 16, 16

    key = jax.random.PRNGKey(0)
    kx, kw1, kw2 = jax.random.split(key, 3)

    x = jax.random.normal(kx, (N, Cin, H, W), dtype=jnp.float32)

    # Conv weights ~ PyTorch kaiming_uniform(a=sqrt(5)): U(-1/sqrt(fan_in), ...)
    b1_bound = 1.0 / (Cin * 9) ** 0.5
    b2_bound = 1.0 / (Cout * 9) ** 0.5
    w1 = jax.random.uniform(kw1, (3, 3, Cin, Cout), jnp.float32, -b1_bound, b1_bound)
    w2 = jax.random.uniform(kw2, (3, 3, Cout, Cout), jnp.float32, -b2_bound, b2_bound)

    # BatchNorm affine params at PyTorch init: gamma=1, beta=0
    g1 = jnp.ones((Cout,), jnp.float32)
    be1 = jnp.zeros((Cout,), jnp.float32)
    g2 = jnp.ones((Cout,), jnp.float32)
    be2 = jnp.zeros((Cout,), jnp.float32)

    out = jax.block_until_ready(double_conv(x, w1, g1, be1, w2, g2, be2))
    ref = jax.block_until_ready(reference(x, w1, g1, be1, w2, g2, be2))

    assert out.shape == (N, Cout, H, W)
    # bf16 matmul inputs (f32 accumulate, f32 BN) => mixed abs/rel tolerance.
    err = float(jnp.max(jnp.abs(out - ref) / (1.0 + jnp.abs(ref))))
    assert err < 3e-2, f"mismatch vs reference: max mixed err {err}"

    print("KERNEL_OK")
</pallas_src>

<mosaic_0001>
module attributes {stable_mosaic.version = 11 : i64} {
  func.func @_double_conv_kernel(%arg0: i32, %arg1: memref<2x16x64xbf16, #tpu.memory_space<vmem>>, %arg2: memref<576x128xbf16, #tpu.memory_space<vmem>>, %arg3: memref<1x128xf32, #tpu.memory_space<vmem>>, %arg4: memref<1x128xf32, #tpu.memory_space<vmem>>, %arg5: memref<1152x128xbf16, #tpu.memory_space<vmem>>, %arg6: memref<1x128xf32, #tpu.memory_space<vmem>>, %arg7: memref<1x128xf32, #tpu.memory_space<vmem>>, %arg8: memref<128x128xf32, #tpu.memory_space<vmem>>, %arg9: memref<32x128xf32, #tpu.memory_space<vmem>>, %arg10: memref<2x18x72xf32, #tpu.memory_space<vmem>>, %arg11: memref<2x18x144xf32, #tpu.memory_space<vmem>>) attributes {dimension_semantics = [#tpu.dimension_semantics<arbitrary>], iteration_bounds = array<i64: 1>, scalar_prefetch = 0 : i64, scratch_operands = 2 : i64, tpu.core_type = #tpu.core_type<tc>, window_params = [{pipeline_mode = #tpu.pipeline_mode<synchronous>, transform_indices = @transform_0, window_bounds = array<i64: 2, 16, 64>}, {pipeline_mode = #tpu.pipeline_mode<synchronous>, transform_indices = @transform_1, window_bounds = array<i64: 576, 128>}, {pipeline_mode = #tpu.pipeline_mode<synchronous>, transform_indices = @transform_2, window_bounds = array<i64: 1, 128>}, {pipeline_mode = #tpu.pipeline_mode<synchronous>, transform_indices = @transform_3, window_bounds = array<i64: 1, 128>}, {pipeline_mode = #tpu.pipeline_mode<synchronous>, transform_indices = @transform_4, window_bounds = array<i64: 1152, 128>}, {pipeline_mode = #tpu.pipeline_mode<synchronous>, transform_indices = @transform_5, window_bounds = array<i64: 1, 128>}, {pipeline_mode = #tpu.pipeline_mode<synchronous>, transform_indices = @transform_6, window_bounds = array<i64: 1, 128>}, {pipeline_mode = #tpu.pipeline_mode<synchronous>, transform_indices = @transform_7, window_bounds = array<i64: 128, 128>}, {pipeline_mode = #tpu.pipeline_mode<synchronous>, transform_indices = @transform_8, window_bounds = array<i64: 32, 128>}]} {
    %c0 = arith.constant 0 : index
    %c0_0 = arith.constant 0 : index
    %0 = vector.load %arg8[%c0, %c0_0] : memref<128x128xf32, #tpu.memory_space<vmem>>, vector<128x128xf32>
    %c0_1 = arith.constant 0 : index
    %c0_2 = arith.constant 0 : index
    %c0_3 = arith.constant 0 : index
    %1 = vector.load %arg1[%c0_1, %c0_2, %c0_3] : memref<2x16x64xbf16, #tpu.memory_space<vmem>>, vector<2x16x64xbf16>
    %2 = arith.extf %1 : vector<2x16x64xbf16> to vector<2x16x64xf32>
    %cst = arith.constant 0.000000e+00 : f32
    %3 = vector.broadcast %cst : f32 to vector<2x1x72xf32>
    %c0_4 = arith.constant 0 : index
    %c0_5 = arith.constant 0 : index
    %c0_6 = arith.constant 0 : index
    %4 = vector.load %arg10[%c0_4, %c0_5, %c0_6] : memref<2x18x72xf32, #tpu.memory_space<vmem>>, vector<2x1x72xf32>
    tpu.vector_store %arg10[%c0_4, %c0_5, %c0_6], %3 {strides = array<i32>} : memref<2x18x72xf32, #tpu.memory_space<vmem>>, vector<2x1x72xf32>,
    %cst_7 = arith.constant 0.000000e+00 : f32
    %5 = vector.broadcast %cst_7 : f32 to vector<2x1x72xf32>
    %c0_8 = arith.constant 0 : index
    %c17 = arith.constant 17 : index
    %c0_9 = arith.constant 0 : index
    %6 = vector.load %arg10[%c0_8, %c17, %c0_9] : memref<2x18x72xf32, #tpu.memory_space<vmem>>, vector<2x1x72xf32>
    tpu.vector_store %arg10[%c0_8, %c17, %c0_9], %5 {strides = array<i32>} : memref<2x18x72xf32, #tpu.memory_space<vmem>>, vector<2x1x72xf32>,
    %cst_10 = arith.constant 0.000000e+00 : f32
    %7 = vector.broadcast %cst_10 : f32 to vector<2x16x4xf32>
    %c0_11 = arith.constant 0 : index
    %c1 = arith.constant 1 : index
    %c0_12 = arith.constant 0 : index
    %8 = vector.load %arg10[%c0_11, %c1, %c0_12] : memref<2x18x72xf32, #tpu.memory_space<vmem>>, vector<2x16x4xf32>
    tpu.vector_store %arg10[%c0_11, %c1, %c0_12], %7 {strides = array<i32>} : memref<2x18x72xf32, #tpu.memory_space<vmem>>, vector<2x16x4xf32>,
    %c0_13 = arith.constant 0 : index
    %c1_14 = arith.constant 1 : index
    %c68 = arith.constant 68 : index
    %9 = vector.load %arg10[%c0_13, %c1_14, %c68] : memref<2x18x72xf32, #tpu.memory_space<vmem>>, vector<2x16x4xf32>
    tpu.vector_store %arg10[%c0_13, %c1_14, %c68], %7 {strides = array<i32>} : memref<2x18x72xf32, #tpu.memory_space<vmem>>, vector<2x16x4xf32>,
    %c0_15 = arith.constant 0 : index
    %c1_16 = arith.constant 1 : index
    %c4 = arith.constant 4 : index
    %10 = vector.load %arg10[%c0_15, %c1_16, %c4] : memref<2x18x72xf32, #tpu.memory_space<vmem>>, vector<2x16x64xf32>
    tpu.vector_store %arg10[%c0_15, %c1_16, %c4], %2 {strides = array<i32>} : memref<2x18x72xf32, #tpu.memory_space<vmem>>, vector<2x16x64xf32>,
    %c0_17 = arith.constant 0 : index
    %c0_18 = arith.constant 0 : index
    %11 = vector.load %arg2[%c0_17, %c0_18] : memref<576x128xbf16, #tpu.memory_space<vmem>>, vector<576x128xbf16>
    %c0_19 = arith.constant 0 : index
    %c0_20 = arith.constant 0 : index
    %c0_21 = arith.constant 0 : index
    %12 = vector.load %arg10[%c0_19, %c0_20, %c0_21] : memref<2x18x72xf32, #tpu.memory_space<vmem>>, vector<2x16x64xf32>
    %13 = vector.shape_cast %12 : vector<2x16x64xf32> to vector<32x64xf32>
    %c0_22 = arith.constant 0 : index
    %c0_23 = arith.constant 0 : index
    %c4_24 = arith.constant 4 : index
    %14 = vector.load %arg10[%c0_22, %c0_23, %c4_24] : memref<2x18x72xf32, #tpu.memory_space<vmem>>, vector<2x16x64xf32>
    %15 = vector.shape_cast %14 : vector<2x16x64xf32> to vector<32x64xf32>
    %c0_25 = arith.constant 0 : index
    %c0_26 = arith.constant 0 : index
    %c8 = arith.constant 8 : index
    %16 = vector.load %arg10[%c0_25, %c0_26, %c8] : memref<2x18x72xf32, #tpu.memory_space<vmem>>, vector<2x16x64xf32>
    %17 = vector.shape_cast %16 : vector<2x16x64xf32> to vector<32x64xf32>
    %c0_27 = arith.constant 0 : index
    %c1_28 = arith.constant 1 : index
    %c0_29 = arith.constant 0 : index
    %18 = vector.load %arg10[%c0_27, %c1_28, %c0_29] : memref<2x18x72xf32, #tpu.memory_space<vmem>>, vector<2x16x64xf32>
    %19 = vector.shape_cast %18 : vector<2x16x64xf32> to vector<32x64xf32>
    %c0_30 = arith.constant 0 : index
    %c1_31 = arith.constant 1 : index
    %c4_32 = arith.constant 4 : index
    %20 = vector.load %arg10[%c0_30, %c1_31, %c4_32] : memref<2x18x72xf32, #tpu.memory_space<vmem>>, vector<2x16x64xf32>
    %21 = vector.shape_cast %20 : vector<2x16x64xf32> to vector<32x64xf32>
    %c0_33 = arith.constant 0 : index
    %c1_34 = arith.constant 1 : index
    %c8_35 = arith.constant 8 : index
    %22 = vector.load %arg10[%c0_33, %c1_34, %c8_35] : memref<2x18x72xf32, #tpu.memory_space<vmem>>, vector<2x16x64xf32>
    %23 = vector.shape_cast %22 : vector<2x16x64xf32> to vector<32x64xf32>
    %c0_36 = arith.constant 0 : index
    %c2 = arith.constant 2 : index
    %c0_37 = arith.constant 0 : index
    %24 = vector.load %arg10[%c0_36, %c2, %c0_37] : memref<2x18x72xf32, #tpu.memory_space<vmem>>, vector<2x16x64xf32>
    %25 = vector.shape_cast %24 : vector<2x16x64xf32> to vector<32x64xf32>
    %c0_38 = arith.constant 0 : index
    %c2_39 = arith.constant 2 : index
    %c4_40 = arith.constant 4 : index
    %26 = vector.load %arg10[%c0_38, %c2_39, %c4_40] : memref<2x18x72xf32, #tpu.memory_space<vmem>>, vector<2x16x64xf32>
    %27 = vector.shape_cast %26 : vector<2x16x64xf32> to vector<32x64xf32>
    %c0_41 = arith.constant 0 : index
    %c2_42 = arith.constant 2 : index
    %c8_43 = arith.constant 8 : index
    %28 = vector.load %arg10[%c0_41, %c2_42, %c8_43] : memref<2x18x72xf32, #tpu.memory_space<vmem>>, vector<2x16x64xf32>
    %29 = vector.shape_cast %28 : vector<2x16x64xf32> to vector<32x64xf32>
    %30 = tpu.concatenate %13, %15, %17, %19, %21, %23, %25, %27, %29 in 1 : vector<32x64xf32>, vector<32x64xf32>, vector<32x64xf32>, vector<32x64xf32>, vector<32x64xf32>, vector<32x64xf32>, vector<32x64xf32>, vector<32x64xf32>, vector<32x64xf32> -> vector<32x576xf32>
    %31 = arith.truncf %30 : vector<32x576xf32> to vector<32x576xbf16>
    %cst_44 = arith.constant dense<0.000000e+00> : vector<32x128xf32>
    %32 = tpu.matmul %31, %11, %cst_44 {dimension_numbers = #tpu.dot_dimension_numbers<[1], [0], [0], [1], [0, 0, 1, 1], [], []>} : vector<32x576xbf16>, vector<576x128xbf16>, vector<32x128xf32> -> vector<32x128xf32>
    %c0_45 = arith.constant 0 : index
    %c0_46 = arith.constant 0 : index
    %33 = vector.load %arg3[%c0_45, %c0_46] : memref<1x128xf32, #tpu.memory_space<vmem>>, vector<1x128xf32>
    %c0_47 = arith.constant 0 : index
    %c0_48 = arith.constant 0 : index
    %34 = vector.load %arg4[%c0_47, %c0_48] : memref<1x128xf32, #tpu.memory_space<vmem>>, vector<1x128xf32>
    %cst_49 = arith.constant dense<0.000000e+00> : vector<128xf32>
    %35 = vector.multi_reduction <add>, %32, %cst_49 [0] : vector<32x128xf32> to vector<128xf32>
    %36 = vector.shape_cast %35 : vector<128xf32> to vector<1x128xf32>
    %37 = arith.mulf %32, %32 : vector<32x128xf32>
    %cst_50 = arith.constant dense<0.000000e+00> : vector<128xf32>
    %38 = vector.multi_reduction <add>, %37, %cst_50 [0] : vector<32x128xf32> to vector<128xf32>
    %39 = vector.shape_cast %38 : vector<128xf32> to vector<1x128xf32>
    %cst_51 = arith.constant dense<0.000000e+00> : vector<1x128xf32>
    %40 = tpu.matmul %36, %0, %cst_51 {dimension_numbers = #tpu.dot_dimension_numbers<[1], [0], [0], [1], [0, 0, 1, 1], [], []>} : vector<1x128xf32>, vector<128x128xf32>, vector<1x128xf32> -> vector<1x128xf32>
    %cst_52 = arith.constant 0.001953125 : f32
    %41 = vector.broadcast %cst_52 : f32 to vector<1x128xf32>
    %42 = arith.mulf %40, %41 : vector<1x128xf32>
    %cst_53 = arith.constant dense<0.000000e+00> : vector<1x128xf32>
    %43 = tpu.matmul %39, %0, %cst_53 {dimension_numbers = #tpu.dot_dimension_numbers<[1], [0], [0], [1], [0, 0, 1, 1], [], []>} : vector<1x128xf32>, vector<128x128xf32>, vector<1x128xf32> -> vector<1x128xf32>
    %cst_54 = arith.constant 0.001953125 : f32
    %44 = vector.broadcast %cst_54 : f32 to vector<1x128xf32>
    %45 = arith.mulf %43, %44 : vector<1x128xf32>
    %46 = arith.mulf %42, %42 : vector<1x128xf32>
    %47 = arith.subf %45, %46 : vector<1x128xf32>
    %cst_55 = arith.constant 9.99999974E-6 : f32
    %48 = vector.broadcast %cst_55 : f32 to vector<1x128xf32>
    %49 = arith.addf %47, %48 : vector<1x128xf32>
    %50 = math.rsqrt %49 : vector<1x128xf32>
    %51 = arith.mulf %33, %50 : vector<1x128xf32>
    %52 = arith.mulf %42, %51 : vector<1x128xf32>
    %53 = arith.subf %34, %52 : vector<1x128xf32>
    %54 = vector.broadcast %51 : vector<1x128xf32> to vector<32x128xf32>
    %55 = arith.mulf %32, %54 : vector<32x128xf32>
    %56 = vector.broadcast %53 : vector<1x128xf32> to vector<32x128xf32>
    %57 = arith.addf %55, %56 : vector<32x128xf32>
    %cst_56 = arith.constant 0.000000e+00 : f32
    %58 = vector.broadcast %cst_56 : f32 to vector<32x128xf32>
    %59 = arith.maximumf %57, %58 : vector<32x128xf32>
    %60 = vector.shape_cast %59 : vector<32x128xf32> to vector<2x16x128xf32>
    %cst_57 = arith.constant 0.000000e+00 : f32
    %61 = vector.broadcast %cst_57 : f32 to vector<2x1x144xf32>
    %c0_58 = arith.constant 0 : index
    %c0_59 = arith.constant 0 : index
    %c0_60 = arith.constant 0 : index
    %62 = vector.load %arg11[%c0_58, %c0_59, %c0_60] : memref<2x18x144xf32, #tpu.memory_space<vmem>>, vector<2x1x144xf32>
    tpu.vector_store %arg11[%c0_58, %c0_59, %c0_60], %61 {strides = array<i32>} : memref<2x18x144xf32, #tpu.memory_space<vmem>>, vector<2x1x144xf32>,
    %cst_61 = arith.constant 0.000000e+00 : f32
    %63 = vector.broadcast %cst_61 : f32 to vector<2x1x144xf32>
    %c0_62 = arith.constant 0 : index
    %c17_63 = arith.constant 17 : index
    %c0_64 = arith.constant 0 : index
    %64 = vector.load %arg11[%c0_62, %c17_63, %c0_64] : memref<2x18x144xf32, #tpu.memory_space<vmem>>, vector<2x1x144xf32>
    tpu.vector_store %arg11[%c0_62, %c17_63, %c0_64], %63 {strides = array<i32>} : memref<2x18x144xf32, #tpu.memory_space<vmem>>, vector<2x1x144xf32>,
    %cst_65 = arith.constant 0.000000e+00 : f32
    %65 = vector.broadcast %cst_65 : f32 to vector<2x16x8xf32>
    %c0_66 = arith.constant 0 : index
    %c1_67 = arith.constant 1 : index
    %c0_68 = arith.constant 0 : index
    %66 = vector.load %arg11[%c0_66, %c1_67, %c0_68] : memref<2x18x144xf32, #tpu.memory_space<vmem>>, vector<2x16x8xf32>
    tpu.vector_store %arg11[%c0_66, %c1_67, %c0_68], %65 {strides = array<i32>} : memref<2x18x144xf32, #tpu.memory_space<vmem>>, vector<2x16x8xf32>,
    %c0_69 = arith.constant 0 : index
    %c1_70 = arith.constant 1 : index
    %c136 = arith.constant 136 : index
    %67 = vector.load %arg11[%c0_69, %c1_70, %c136] : memref<2x18x144xf32, #tpu.memory_space<vmem>>, vector<2x16x8xf32>
    tpu.vector_store %arg11[%c0_69, %c1_70, %c136], %65 {strides = array<i32>} : memref<2x18x144xf32, #tpu.memory_space<vmem>>, vector<2x16x8xf32>,
    %c0_71 = arith.constant 0 : index
    %c1_72 = arith.constant 1 : index
    %c8_73 = arith.constant 8 : index
    %68 = vector.load %arg11[%c0_71, %c1_72, %c8_73] : memref<2x18x144xf32, #tpu.memory_space<vmem>>, vector<2x16x128xf32>
    tpu.vector_store %arg11[%c0_71, %c1_72, %c8_73], %60 {strides = array<i32>} : memref<2x18x144xf32, #tpu.memory_space<vmem>>, vector<2x16x128xf32>,
    %c0_74 = arith.constant 0 : index
    %c0_75 = arith.constant 0 : index
    %69 = vector.load %arg5[%c0_74, %c0_75] : memref<1152x128xbf16, #tpu.memory_space<vmem>>, vector<1152x128xbf16>
    %c0_76 = arith.constant 0 : index
    %c0_77 = arith.constant 0 : index
    %c0_78 = arith.constant 0 : index
    %70 = vector.load %arg11[%c0_76, %c0_77, %c0_78] : memref<2x18x144xf32, #tpu.memory_space<vmem>>, vector<2x16x128xf32>
    %71 = vector.shape_cast %70 : vector<2x16x128xf32> to vector<32x128xf32>
    %c0_79 = arith.constant 0 : index
    %c0_80 = arith.constant 0 : index
    %c8_81 = arith.constant 8 : index
    %72 = vector.load %arg11[%c0_79, %c0_80, %c8_81] : memref<2x18x144xf32, #tpu.memory_space<vmem>>, vector<2x16x128xf32>
    %73 = vector.shape_cast %72 : vector<2x16x128xf32> to vector<32x128xf32>
    %c0_82 = arith.constant 0 : index
    %c0_83 = arith.constant 0 : index
    %c16 = arith.constant 16 : index
    %74 = vector.load %arg11[%c0_82, %c0_83, %c16] : memref<2x18x144xf32, #tpu.memory_space<vmem>>, vector<2x16x128xf32>
    %75 = vector.shape_cast %74 : vector<2x16x128xf32> to vector<32x128xf32>
    %c0_84 = arith.constant 0 : index
    %c1_85 = arith.constant 1 : index
    %c0_86 = arith.constant 0 : index
    %76 = vector.load %arg11[%c0_84, %c1_85, %c0_86] : memref<2x18x144xf32, #tpu.memory_space<vmem>>, vector<2x16x128xf32>
    %77 = vector.shape_cast %76 : vector<2x16x128xf32> to vector<32x128xf32>
    %c0_87 = arith.constant 0 : index
    %c1_88 = arith.constant 1 : index
    %c8_89 = arith.constant 8 : index
    %78 = vector.load %arg11[%c0_87, %c1_88, %c8_89] : memref<2x18x144xf32, #tpu.memory_space<vmem>>, vector<2x16x128xf32>
    %79 = vector.shape_cast %78 : vector<2x16x128xf32> to vector<32x128xf32>
    %c0_90 = arith.constant 0 : index
    %c1_91 = arith.constant 1 : index
    %c16_92 = arith.constant 16 : index
    %80 = vector.load %arg11[%c0_90, %c1_91, %c16_92] : memref<2x18x144xf32, #tpu.memory_space<vmem>>, vector<2x16x128xf32>
    %81 = vector.shape_cast %80 : vector<2x16x128xf32> to vector<32x128xf32>
    %c0_93 = arith.constant 0 : index
    %c2_94 = arith.constant 2 : index
    %c0_95 = arith.constant 0 : index
    %82 = vector.load %arg11[%c0_93, %c2_94, %c0_95] : memref<2x18x144xf32, #tpu.memory_space<vmem>>, vector<2x16x128xf32>
    %83 = vector.shape_cast %82 : vector<2x16x128xf32> to vector<32x128xf32>
    %c0_96 = arith.constant 0 : index
    %c2_97 = arith.constant 2 : index
    %c8_98 = arith.constant 8 : index
    %84 = vector.load %arg11[%c0_96, %c2_97, %c8_98] : memref<2x18x144xf32, #tpu.memory_space<vmem>>, vector<2x16x128xf32>
    %85 = vector.shape_cast %84 : vector<2x16x128xf32> to vector<32x128xf32>
    %c0_99 = arith.constant 0 : index
    %c2_100 = arith.constant 2 : index
    %c16_101 = arith.constant 16 : index
    %86 = vector.load %arg11[%c0_99, %c2_100, %c16_101] : memref<2x18x144xf32, #tpu.memory_space<vmem>>, vector<2x16x128xf32>
    %87 = vector.shape_cast %86 : vector<2x16x128xf32> to vector<32x128xf32>
    %88 = tpu.concatenate %71, %73, %75, %77, %79, %81, %83, %85, %87 in 1 : vector<32x128xf32>, vector<32x128xf32>, vector<32x128xf32>, vector<32x128xf32>, vector<32x128xf32>, vector<32x128xf32>, vector<32x128xf32>, vector<32x128xf32>, vector<32x128xf32> -> vector<32x1152xf32>
    %89 = arith.truncf %88 : vector<32x1152xf32> to vector<32x1152xbf16>
    %cst_102 = arith.constant dense<0.000000e+00> : vector<32x128xf32>
    %90 = tpu.matmul %89, %69, %cst_102 {dimension_numbers = #tpu.dot_dimension_numbers<[1], [0], [0], [1], [0, 0, 1, 1], [], []>} : vector<32x1152xbf16>, vector<1152x128xbf16>, vector<32x128xf32> -> vector<32x128xf32>
    %c0_103 = arith.constant 0 : index
    %c0_104 = arith.constant 0 : index
    %91 = vector.load %arg6[%c0_103, %c0_104] : memref<1x128xf32, #tpu.memory_space<vmem>>, vector<1x128xf32>
    %c0_105 = arith.constant 0 : index
    %c0_106 = arith.constant 0 : index
    %92 = vector.load %arg7[%c0_105, %c0_106] : memref<1x128xf32, #tpu.memory_space<vmem>>, vector<1x128xf32>
    %cst_107 = arith.constant dense<0.000000e+00> : vector<128xf32>
    %93 = vector.multi_reduction <add>, %90, %cst_107 [0] : vector<32x128xf32> to vector<128xf32>
    %94 = vector.shape_cast %93 : vector<128xf32> to vector<1x128xf32>
    %95 = arith.mulf %90, %90 : vector<32x128xf32>
    %cst_108 = arith.constant dense<0.000000e+00> : vector<128xf32>
    %96 = vector.multi_reduction <add>, %95, %cst_108 [0] : vector<32x128xf32> to vector<128xf32>
    %97 = vector.shape_cast %96 : vector<128xf32> to vector<1x128xf32>
    %cst_109 = arith.constant dense<0.000000e+00> : vector<1x128xf32>
    %98 = tpu.matmul %94, %0, %cst_109 {dimension_numbers = #tpu.dot_dimension_numbers<[1], [0], [0], [1], [0, 0, 1, 1], [], []>} : vector<1x128xf32>, vector<128x128xf32>, vector<1x128xf32> -> vector<1x128xf32>
    %cst_110 = arith.constant 0.001953125 : f32
    %99 = vector.broadcast %cst_110 : f32 to vector<1x128xf32>
    %100 = arith.mulf %98, %99 : vector<1x128xf32>
    %cst_111 = arith.constant dense<0.000000e+00> : vector<1x128xf32>
    %101 = tpu.matmul %97, %0, %cst_111 {dimension_numbers = #tpu.dot_dimension_numbers<[1], [0], [0], [1], [0, 0, 1, 1], [], []>} : vector<1x128xf32>, vector<128x128xf32>, vector<1x128xf32> -> vector<1x128xf32>
    %cst_112 = arith.constant 0.001953125 : f32
    %102 = vector.broadcast %cst_112 : f32 to vector<1x128xf32>
    %103 = arith.mulf %101, %102 : vector<1x128xf32>
    %104 = arith.mulf %100, %100 : vector<1x128xf32>
    %105 = arith.subf %103, %104 : vector<1x128xf32>
    %cst_113 = arith.constant 9.99999974E-6 : f32
    %106 = vector.broadcast %cst_113 : f32 to vector<1x128xf32>
    %107 = arith.addf %105, %106 : vector<1x128xf32>
    %108 = math.rsqrt %107 : vector<1x128xf32>
    %109 = arith.mulf %91, %108 : vector<1x128xf32>
    %110 = arith.mulf %100, %109 : vector<1x128xf32>
    %111 = arith.subf %92, %110 : vector<1x128xf32>
    %112 = vector.broadcast %109 : vector<1x128xf32> to vector<32x128xf32>
    %113 = arith.mulf %90, %112 : vector<32x128xf32>
    %114 = vector.broadcast %111 : vector<1x128xf32> to vector<32x128xf32>
    %115 = arith.addf %113, %114 : vector<32x128xf32>
    %cst_114 = arith.constant 0.000000e+00 : f32
    %116 = vector.broadcast %cst_114 : f32 to vector<32x128xf32>
    %117 = arith.maximumf %115, %116 : vector<32x128xf32>
    %c0_115 = arith.constant 0 : index
    %c0_116 = arith.constant 0 : index
    %118 = vector.load %arg9[%c0_115, %c0_116] : memref<32x128xf32, #tpu.memory_space<vmem>>, vector<32x128xf32>
    tpu.vector_store %arg9[%c0_115, %c0_116], %117 {strides = array<i32>} : memref<32x128xf32, #tpu.memory_space<vmem>>, vector<32x128xf32>,
    return
  }
  func.func @transform_0(%arg0: i32) -> (i32, i32, i32) {
    %c0_i32 = arith.constant 0 : i32
    %c0_i32_0 = arith.constant 0 : i32
    %c0_i32_1 = arith.constant 0 : i32
    %c0_i32_2 = arith.constant 0 : i32
    return %c0_i32, %c0_i32_0, %c0_i32_1 : i32, i32, i32
  }
  func.func @transform_1(%arg0: i32) -> (i32, i32) {
    %c0_i32 = arith.constant 0 : i32
    %c0_i32_0 = arith.constant 0 : i32
    %c0_i32_1 = arith.constant 0 : i32
    return %c0_i32, %c0_i32_0 : i32, i32
  }
  func.func @transform_2(%arg0: i32) -> (i32, i32) {
    %c0_i32 = arith.constant 0 : i32
    %c0_i32_0 = arith.constant 0 : i32
    %c0_i32_1 = arith.constant 0 : i32
    return %c0_i32, %c0_i32_0 : i32, i32
  }
  func.func @transform_3(%arg0: i32) -> (i32, i32) {
    %c0_i32 = arith.constant 0 : i32
    %c0_i32_0 = arith.constant 0 : i32
    %c0_i32_1 = arith.constant 0 : i32
    return %c0_i32, %c0_i32_0 : i32, i32
  }
  func.func @transform_4(%arg0: i32) -> (i32, i32) {
    %c0_i32 = arith.constant 0 : i32
    %c0_i32_0 = arith.constant 0 : i32
    %c0_i32_1 = arith.constant 0 : i32
    return %c0_i32, %c0_i32_0 : i32, i32
  }
  func.func @transform_5(%arg0: i32) -> (i32, i32) {
    %c0_i32 = arith.constant 0 : i32
    %c0_i32_0 = arith.constant 0 : i32
    %c0_i32_1 = arith.constant 0 : i32
    return %c0_i32, %c0_i32_0 : i32, i32
  }
  func.func @transform_6(%arg0: i32) -> (i32, i32) {
    %c0_i32 = arith.constant 0 : i32
    %c0_i32_0 = arith.constant 0 : i32
    %c0_i32_1 = arith.constant 0 : i32
    return %c0_i32, %c0_i32_0 : i32, i32
  }
  func.func @transform_7(%arg0: i32) -> (i32, i32) {
    %c0_i32 = arith.constant 0 : i32
    %c0_i32_0 = arith.constant 0 : i32
    %c0_i32_1 = arith.constant 0 : i32
    return %c0_i32, %c0_i32_0 : i32, i32
  }
  func.func @transform_8(%arg0: i32) -> (i32, i32) {
    %c0_i32 = arith.constant 0 : i32
    %c0_i32_0 = arith.constant 0 : i32
    %c0_i32_1 = arith.constant 0 : i32
    return %c0_i32, %c0_i32_0 : i32, i32
  }
}

</mosaic_0001>

<bundles_post_ra>
// kernel: double_conv.1
= control target key start
LH: loop header
LB: loop body
LE: loop exit
PB: predicated region body
PF: predicated region fallthrough
CT: control target
= control target key end

     0   :  { %vm59_vm0 = vcmask 31744   ;;  %vm64_vm1 = vcmask 589344   ;;  %v2688_v1 = vmov 0.0   ;;  %s2689_s9 = smov 4   ;;  %vm54_vm2 = vcmask 581632   ;;  %s2691_s10 = smov 124   ;;  %s3487_s0 = inlined_call_operand.vmem [shape: bf16[2,16,64], index: 0, kind: input, shape index: {}]   ;;  %s3488_s1 = inlined_call_operand.vmem [shape: bf16[576,128], index: 1, kind: input, shape index: {}]   ;;  %s3489_s7 = inlined_call_operand.vmem [shape: f32[128,128], index: 7, kind: input, shape index: {}]   ;;  %s3490_s2 = inlined_call_operand.vmem [shape: f32[1,128], index: 2, kind: input, shape index: {}]   ;;  %s3491_s3 = inlined_call_operand.vmem [shape: f32[1,128], index: 3, kind: input, shape index: {}]   ;;  %s3492_s4 = inlined_call_operand.vmem [shape: bf16[1152,128], index: 4, kind: input, shape index: {}]   ;;  %s3493_s5 = inlined_call_operand.vmem [shape: f32[1,128], index: 5, kind: input, shape index: {}]   ;;  %s3494_s6 = inlined_call_operand.vmem [shape: f32[1,128], index: 6, kind: input, shape index: {}]   ;;  %s3495_s8 = inlined_call_operand.vmem [shape: f32[32,128], index: 8, kind: output, shape index: {}]  }
   0x1   :  { %v2451_v0 = vld [vmem:[%s3487_s0] sm:$0xff]   ;;  %60 = vst.msk [vmem:[#allocation2 + $0x1] sm:$0xff] %vm59_vm0, %v2688_v1  ;;  %v2458_v4 = vld [vmem:[%s3487_s0 + $0x8] sm:$0xff]   ;;  %vm85_vm3 = vcmask 556064   ;;  %s2690_s0 = smov 60   ;;  %v2365_v24 = vld [vmem:[%s3488_s1 + $0xb8] sm:$0xff] }
   0x2   :  { %v2452_v2 = vunpack.c.l.bf16 %v2451_v0  ;;  %v2453_v3 = vunpack.c.h.bf16 %v2451_v0  ;;  %61 = vst.msk [vmem:[#allocation2 + $0x9] sm:$0xff] %vm59_vm0, %v2688_v1  ;;  %v2456_v6 = vunpack.c.l.bf16 %v2458_v4  ;;  %v2457_v7 = vunpack.c.h.bf16 %v2458_v4  ;;  %v2349_v25 = vld [vmem:[%s3488_s1 + $0x38] sm:$0xff]  ;;  %557 = vmatpush.bf16.msra.mxu2 %v2365_v24  ;;  %v2364_v26 = vld [vmem:[%s3488_s1 + $0xb0] sm:$0xff]  ;;  %v2363_v31 = vld [vmem:[%s3488_s1 + $0xa8] sm:$0xff]  ;;  %s2692_s21 = smov 120   ;;  %s2693_s22 = smov 56  }
   0x3   :  { %65 = vst.msk [vmem:[#allocation2 + $0x1] sm:$0xff] %vm64_vm1, %v2688_v1  ;;  %v2373_v27 = vld [vmem:[%s3488_s1 + $0xf8] sm:$0xff]  ;;  %519 = vmatpush.bf16.msra.mxu0 %v2349_v25  ;;  %v2362_v34 = vld [vmem:[%s3488_s1 + $0xa0] sm:$0xff]  ;;  %s2694_s27 = smov 64   ;;  %v2348_v40 = vld [vmem:[%s3488_s1 + $0x30] sm:$0xff]  ;;  %vm270_vm4 = vcmask 523264  }
   0x4   :  { %v2468_v5 = vpack.i.bf16 %v2453_v3, %v2452_v2  ;;  %66 = vst.msk [vmem:[#allocation2 + $0x9] sm:$0xff] %vm64_vm1, %v2688_v1  ;;  %v2473_v8 = vpack.i.bf16 %v2457_v7, %v2456_v6  ;;  %576 = vmatpush.bf16.msra.mxu3 %v2373_v27  ;;  %v2361_v36 = vld [vmem:[%s3488_s1 + $0x98] sm:$0xff]  ;;  %v2360_v41 = vld [vmem:[%s3488_s1 + $0x90] sm:$0xff]  ;;  %v2347_v43 = vld [vmem:[%s3488_s1 + $0x28] sm:$0xff]  ;;  %vm731_vm5 = vcmask 64512   ;;  %vm740_vm6 = vcmask 130112  }
   0x5   :  { %62 = vst.msk [vmem:[#allocation2 + $0x19] sm:$0xff] %vm59_vm0, %v2688_v1  ;;  %v2372_v42 = vld [vmem:[%s3488_s1 + $0xf0] sm:$0xff]  ;;  %v2359_v44 = vld [vmem:[%s3488_s1 + $0x88] sm:$0xff]  ;;  %v2346_v46 = vld [vmem:[%s3488_s1 + $0x20] sm:$0xff]  ;;  %vm751_vm10 = vcmask 1040384   ;;  %vm733_vm11 = vcmask 57344  }
   0x6   :  { %2469 = vrot.lane.b32.xlu0 %v2468_v5, %s2689_s9  ;;  %63 = vst.msk [vmem:[#allocation2 + $0x21] sm:$0xff] %vm59_vm0, %v2688_v1  ;;  %558 = vmatpush.bf16.msra.mxu2 %v2364_v26  ;;  %v2371_v45 = vld [vmem:[%s3488_s1 + $0xe8] sm:$0xff]  ;;  %v2358_v47 = vld [vmem:[%s3488_s1 + $0x80] sm:$0xff]  ;;  %v2345_v49 = vld [vmem:[%s3488_s1 + $0x18] sm:$0xff]  ;;  %vm742_vm12 = vcmask 122944   ;;  %vm729_vm13 = vcmask 64513  }
   0x7   :  { %67 = vst.msk [vmem:[#allocation2 + $0x19] sm:$0xff] %vm64_vm1, %v2688_v1  ;;  %520 = vmatpush.bf16.msra.mxu0 %v2348_v40  ;;  %v2370_v48 = vld [vmem:[%s3488_s1 + $0xe0] sm:$0xff]  ;;  %v2357_v50 = vld [vmem:[%s3488_s1 + $0x78] sm:$0xff]  ;;  %v2344_v52 = vld [vmem:[%s3488_s1 + $0x10] sm:$0xff]  ;;  %vm738_vm14 = vcmask 130113   ;;  %vm779_vm0 = vcmask 1047616  }
   0x8   :  { %68 = vst.msk [vmem:[#allocation2 + $0x21] sm:$0xff] %vm64_vm1, %v2688_v1  ;;  %577 = vmatpush.bf16.msra.mxu3 %v2372_v42  ;;  %v2369_v51 = vld [vmem:[%s3488_s1 + $0xd8] sm:$0xff]  ;;  %538 = vmatpush.bf16.msra.mxu1 %v2357_v50  ;;  %v2356_v53 = vld [vmem:[%s3488_s1 + $0x70] sm:$0xff]  ;;  %v2343_v55 = vld [vmem:[%s3488_s1 + $0x8] sm:$0xff]  ;;  %s2696_s15 = smov 112   ;;  %vm782_vm1 = vcmask 1040448  }
   0x9   :  { %57 = vst.msk [vmem:[#allocation2 + $0x11] sm:$0x1] %vm54_vm2, %v2688_v1  ;;  %v2368_v54 = vld [vmem:[%s3488_s1 + $0xd0] sm:$0xff]  ;;  %v2355_v56 = vld [vmem:[%s3488_s1 + $0x68] sm:$0xff]  ;;  %v2342_v58 = vld [vmem:[%s3488_s1] sm:$0xff] }
   0xa   :  { %55 = vst.msk [vmem:[#allocation2] sm:$0x1] %vm54_vm2, %v2688_v1  ;;  %559 = vmatpush.bf16.msra.mxu2 %v2363_v31  ;;  %v2367_v57 = vld [vmem:[%s3488_s1 + $0xc8] sm:$0xff]  ;;  %v2354_v59 = vld [vmem:[%s3488_s1 + $0x60] sm:$0xff]  ;;  %v2353_v61 = vld [vmem:[%s3488_s1 + $0x58] sm:$0xff] }
   0xb   :  { %56 = vst.msk [vmem:[#allocation2 + $0x18] sm:$0x1] %vm54_vm2, %v2688_v1  ;;  %521 = vmatpush.bf16.msra.mxu0 %v2347_v43  ;;  %v2366_v60 = vld [vmem:[%s3488_s1 + $0xc0] sm:$0xff]  ;;  %v2377_v62 = vld [vmem:[%s3488_s1 + $0x118] sm:$0xff]  ;;  %v2352_v0 = vld [vmem:[%s3488_s1 + $0x50] sm:$0xff] }
   0xc   :  { %58 = vst.msk [vmem:[#allocation2 + $0x29] sm:$0x1] %vm54_vm2, %v2688_v1  ;;  %578 = vmatpush.bf16.msra.mxu3 %v2371_v45  ;;  %539 = vmatpush.bf16.msra.mxu1 %v2356_v53  ;;  %v2376_v2 = vld [vmem:[%s3488_s1 + $0x110] sm:$0xff]  ;;  %v2351_v3 = vld [vmem:[%s3488_s1 + $0x48] sm:$0xff]  ;;  %vm776_vm2 = vcmask 1047617  }
   0xd   :  { %732 = vst.msk [vmem:[#allocation3 + $0x10] sm:$0xff] %vm731_vm5, %v2688_v1 }
   0xe   :  { %2474 = vrot.lane.b32.xlu0 %v2473_v8, %s2689_s9  ;;  %560 = vmatpush.bf16.msra.mxu2 %v2362_v34  ;;  %741 = vst.msk [vmem:[#allocation3 + $0x18] sm:$0xff] %vm740_vm6, %v2688_v1 }
   0xf   :  { %522 = vmatpush.bf16.msra.mxu0 %v2346_v46  ;;  %736 = vst.msk [vmem:[#allocation3 + $0x40] sm:$0xff] %vm731_vm5, %v2688_v1 }
  0x10   :  { %579 = vmatpush.bf16.msra.mxu3 %v2370_v48  ;;  %540 = vmatpush.bf16.msra.mxu1 %v2355_v56  ;;  %745 = vst.msk [vmem:[#allocation3 + $0x48] sm:$0xff] %vm740_vm6, %v2688_v1  ;;  %vm1049_vm6 = vcmask 982016  }
  0x11   :  { %734 = vst.msk [vmem:[#allocation3 + $0x20] sm:$0x1] %vm733_vm11, %v2688_v1 }
  0x12   :  { %561 = vmatpush.bf16.msra.mxu2 %v2361_v36  ;;  %743 = vst.msk [vmem:[#allocation3 + $0x28] sm:$0x1] %vm742_vm12, %v2688_v1 }
  0x13   :  { %523 = vmatpush.bf16.msra.mxu0 %v2345_v49  ;;  %737 = vst.msk [vmem:[#allocation3 + $0x50] sm:$0x1] %vm733_vm11, %v2688_v1 }
  0x14   :  { %580 = vmatpush.bf16.msra.mxu3 %v2369_v51  ;;  %541 = vmatpush.bf16.msra.mxu1 %v2354_v59  ;;  %746 = vst.msk [vmem:[#allocation3 + $0x58] sm:$0x1] %vm742_vm12, %v2688_v1 }
  0x15   :  { %730 = vst.msk [vmem:[#allocation3] sm:$0xfe] %vm729_vm13, %v2688_v1 }
  0x16   :  { %562 = vmatpush.bf16.msra.mxu2 %v2360_v41  ;;  %739 = vst.msk [vmem:[#allocation3 + $0x8] sm:$0xfe] %vm738_vm14, %v2688_v1 }
  0x17   :  { %524 = vmatpush.bf16.msra.mxu0 %v2344_v52  ;;  %735 = vst.msk [vmem:[#allocation3 + $0x30] sm:$0xfe] %vm729_vm13, %v2688_v1 }
  0x18   :  { %581 = vmatpush.bf16.msra.mxu3 %v2368_v54  ;;  %542 = vmatpush.bf16.msra.mxu1 %v2353_v61  ;;  %744 = vst.msk [vmem:[#allocation3 + $0x38] sm:$0xfe] %vm738_vm14, %v2688_v1 }
  0x1a   :  { %563 = vmatpush.bf16.msra.mxu2 %v2359_v44 }
  0x1b   :  { %525 = vmatpush.bf16.msra.mxu0 %v2343_v55 }
  0x1c   :  { %582 = vmatpush.bf16.msra.mxu3 %v2367_v57  ;;  %543 = vmatpush.bf16.msra.mxu1 %v2352_v0 }
  0x1e   :  { %564 = vmatpush.bf16.msra.mxu2 %v2358_v47 }
  0x1f   :  { %526 = vmatpush.bf16.msra.mxu0 %v2342_v58 }
  0x20   :  { %583 = vmatpush.bf16.msra.mxu3 %v2366_v60  ;;  %544 = vmatpush.bf16.msra.mxu1 %v2351_v3 }
  0x23   :  { %599 = vmatpush.bf16.msrb.mxu0 %v2377_v62 }
  0x27   :  { %600 = vmatpush.bf16.msrb.mxu0 %v2376_v2 }
  0x78   :  { %v2470_v9 = vpop.permute.xlu0 %2469 }
  0x79   :  { %v2472_v10 = vunpack.i.h.bf16 %v2470_v9  ;;  %v2471_v11 = vunpack.i.l.bf16 %v2470_v9  ;;  %v2350_v9 = vld [vmem:[%s3488_s1 + $0x40] sm:$0xff] }
  0x7a   :  { %545 = vmatpush.bf16.msra.mxu1 %v2350_v9 }
  0x7b   :  { %87 = vst.msk [vmem:[#allocation2 + $0x9] sm:$0xff] %vm85_vm3, %v2472_v10 }
  0x7c   :  { %86 = vst.msk [vmem:[#allocation2 + $0x1] sm:$0xff] %vm85_vm3, %v2471_v11 }
  0x80   :  { %v2475_v12 = vpop.permute.xlu0 %2474 }
  0x81   :  { %v2477_v13 = vunpack.i.h.bf16 %v2475_v12  ;;  %v2476_v14 = vunpack.i.l.bf16 %v2475_v12 }
  0x82   :  { %v2768_v15 = vld [vmem:[#allocation2 + $0xa] sm:$0xff] }
  0x83   :  { %v167_v16 = vld [vmem:[#allocation2 + $0x9] sm:$0xff]  ;;  %89 = vst.msk [vmem:[#allocation2 + $0x21] sm:$0xff] %vm85_vm3, %v2477_v13  ;;  %v166_v18 = vld [vmem:[#allocation2 + $0x1] sm:$0xff] }
  0x84   :  { %v2770_v17 = vld [vmem:[#allocation2 + $0x2] sm:$0xff]  ;;  %88 = vst.msk [vmem:[#allocation2 + $0x19] sm:$0xff] %vm85_vm3, %v2476_v14  ;;  %v2488_v21 = vpack.i.bf16 %v167_v16, %v166_v18  ;;  %vm953_vm3 = vcmask 1046528  }
  0x85   :  { %v2772_v19 = vld [vmem:[#allocation2] sm:$0xff]  ;;  %v2498_v20 = vpack.i.bf16 %v2768_v15, %v2770_v17  ;;  %v2776_v22 = vld [vmem:[#allocation2 + $0x8] sm:$0xff] }
  0x86   :  { %v2478_v23 = vpack.i.bf16 %v2776_v22, %v2772_v19  ;;  %2489 = vrot.lane.b32.xlu2 %v2488_v21, %s2691_s10  ;;  %v2375_v13 = vld [vmem:[%s3488_s1 + $0x108] sm:$0xff]  ;;  %v2374_v14 = vld [vmem:[%s3488_s1 + $0x100] sm:$0xff] }
  0x87   :  { %2499 = vrot.lane.b32.xlu0 %v2498_v20, %s2690_s0  ;;  %601 = vmatpush.bf16.msrb.mxu0 %v2375_v13  ;;  %v2937_v13 = vld [vmem:[%s3489_s7 + $0x78] sm:$0xff] }
  0x88   :  { %2479 = vrot.lane.b32.xlu1 %v2478_v23, %s2690_s0  ;;  %638 = vmatpush.msrb.mxu1 %v2937_v13 }
  0x89   :  { %659 = vmatpush.msrb.mxu2 %v2937_v13 }
  0x8a   :  { %v2805_v33 = vld [vmem:[#allocation2 + $0x22] sm:$0xff] }
  0x8b   :  { %v2793_v28 = vld [vmem:[#allocation2 + $0x18] sm:$0xff]  ;;  %v2795_v29 = vld [vmem:[#allocation2 + $0x20] sm:$0xff]  ;;  %602 = vmatpush.bf16.msrb.mxu0 %v2374_v14  ;;  %v2944_v14 = vld [vmem:[%s3489_s7 + $0x70] sm:$0xff] }
  0x8c   :  { %v2483_v30 = vpack.i.bf16 %v2795_v29, %v2793_v28  ;;  %v2803_v32 = vld [vmem:[#allocation2 + $0x1a] sm:$0xff]  ;;  %639 = vmatpush.msrb.mxu1 %v2944_v14  ;;  %660 = vmatpush.msrb.mxu2 %v2944_v14 }
  0x8d   :  { %v2528_v35 = vpack.i.bf16 %v2805_v33, %v2803_v32  ;;  %v168_v37 = vld [vmem:[#allocation2 + $0x19] sm:$0xff]  ;;  %v169_v38 = vld [vmem:[#allocation2 + $0x21] sm:$0xff] }
  0x8e   :  { %2494 = vrot.lane.b32.xlu2 %v2488_v21, %s2693_s22  ;;  %v2523_v39 = vpack.i.bf16 %v169_v38, %v168_v37 }
  0x8f   :  { %2514 = vrot.lane.b32.xlu0 %v2498_v20, %s2692_s21 }
  0x90   :  { %2484 = vrot.lane.b32.xlu1 %v2483_v30, %s2690_s0 }
  0x96   :  { %2509 = vrot.lane.b32.xlu2 %v2488_v21, %s2694_s27 }
  0x97   :  { %2529 = vrot.lane.b32.xlu0 %v2528_v35, %s2690_s0 }
  0x98   :  { %2504 = vrot.lane.b32.xlu1 %v2478_v23, %s2692_s21 }
  0x9e   :  { %2524 = vrot.lane.b32.xlu2 %v2523_v39, %s2693_s22 }
  0x9f   :  { %2544 = vrot.lane.b32.xlu0 %v2528_v35, %s2692_s21 }
  0xa0   :  { %2519 = vrot.lane.b32.xlu1 %v2523_v39, %s2691_s10 }
  0xa6   :  { %2539 = vrot.lane.b32.xlu2 %v2523_v39, %s2694_s27 }
  0xa8   :  { %2534 = vrot.lane.b32.xlu1 %v2483_v30, %s2692_s21 }
  0xe0   :  { %v2490_v63 = vpop.permute.xlu2 %2489 }
  0xe1   :  { %v2492_v5 = vunpack.i.h.bf16 %v2490_v63  ;;  %v2491_v6 = vunpack.i.l.bf16 %v2490_v63 }
  0xe8   :  { %v2495_v4 = vpop.permute.xlu2 %2494 }
  0xe9   :  { %v2497_v7 = vunpack.i.h.bf16 %v2495_v4  ;;  %v2496_v8 = vunpack.i.l.bf16 %v2495_v4 }
  0xeb   :  { %v279_v10 = vsel %vm270_vm4, %v2491_v6, %v2496_v8  ;;  %v280_v11 = vsel %vm270_vm4, %v2492_v5, %v2497_v7 }
  0xec   :  { %v289_v12 = vpack.c.bf16 %v280_v11, %v279_v10 }
  0xee   :  { %565 = vmatmul.bf16.vlgmr.msra.gmra.mxu2 %v289_v12 }
  0xf0   :  { %v2510_v37 = vpop.permute.xlu2 %2509 }
  0xf1   :  { %v2511_v41 = vunpack.i.l.bf16 %v2510_v37 }
  0xf8   :  { %v2525_v51 = vpop.permute.xlu2 %2524 }
  0xf9   :  { %v2500_v16 = vpop.permute.xlu0 %2499  ;;  %v2527_v54 = vunpack.i.h.bf16 %v2525_v51 }
  0xfa   :  { %v2502_v18 = vunpack.i.h.bf16 %v2500_v16  ;;  %v2501_v20 = vunpack.i.l.bf16 %v2500_v16  ;;  %v2480_v21 = vpop.permute.xlu1 %2479  ;;  %v2951_v16 = vld [vmem:[%s3489_s7 + $0x68] sm:$0xff] }
  0xfb   :  { %v2482_v23 = vunpack.i.h.bf16 %v2480_v21  ;;  %v2481_v24 = vunpack.i.l.bf16 %v2480_v21  ;;  %640 = vmatpush.msrb.mxu1 %v2951_v16  ;;  %661 = vmatpush.msrb.mxu2 %v2951_v16 }
  0xfc   :  { %v283_v25 = vsel %vm270_vm4, %v2770_v17, %v2501_v20  ;;  %v284_v26 = vsel %vm270_vm4, %v2768_v15, %v2502_v18  ;;  %v2512_v17 = vunpack.i.h.bf16 %v2510_v37  ;;  %v2958_v18 = vld [vmem:[%s3489_s7 + $0x60] sm:$0xff]  ;;  %v3007_v37 = vld [vmem:[%s3489_s7 + $0x28] sm:$0xff] }
  0xfd   :  { %v271_v27 = vsel %vm270_vm4, %v2772_v19, %v2481_v24  ;;  %v272_v30 = vsel %vm270_vm4, %v2776_v22, %v2482_v23  ;;  %v290_v31 = vpack.c.bf16 %v284_v26, %v283_v25  ;;  %641 = vmatpush.msrb.mxu1 %v2958_v18  ;;  %662 = vmatpush.msrb.mxu2 %v2958_v18  ;;  %v2965_v23 = vld [vmem:[%s3489_s7 + $0x58] sm:$0xff]  ;;  %v2972_v24 = vld [vmem:[%s3489_s7 + $0x50] sm:$0xff]  ;;  %v2979_v25 = vld [vmem:[%s3489_s7 + $0x48] sm:$0xff] }
  0xfe   :  { %v287_v34 = vpack.c.bf16 %v272_v30, %v271_v27  ;;  %v2986_v30 = vld [vmem:[%s3489_s7 + $0x40] sm:$0xff] }
  0xff   :  { %584 = vmatmul.bf16.vlgmr.msra.gmra.mxu3 %v290_v31  ;;  %642 = vmatpush.msrb.mxu1 %v2965_v23 }
 0x100   :  { %527 = vmatmul.bf16.vlgmr.msra.gmra.mxu0 %v287_v34  ;;  %v2540_v58 = vpop.permute.xlu2 %2539  ;;  %663 = vmatpush.msrb.mxu2 %v2965_v23 }
 0x101   :  { %v2515_v35 = vpop.permute.xlu0 %2514  ;;  %v2542_v62 = vunpack.i.h.bf16 %v2540_v58  ;;  %v2541_v63 = vunpack.i.l.bf16 %v2540_v58  ;;  %643 = vmatpush.msrb.mxu1 %v2972_v24 }
 0x102   :  { %v2485_v36 = vpop.permute.xlu1 %2484  ;;  %v2517_v59 = vunpack.i.h.bf16 %v2515_v35  ;;  %v2516_v60 = vunpack.i.l.bf16 %v2515_v35  ;;  %664 = vmatpush.msrb.mxu2 %v2972_v24  ;;  %v2993_v35 = vld [vmem:[%s3489_s7 + $0x38] sm:$0xff] }
 0x103   :  { %v2487_v38 = vunpack.i.h.bf16 %v2485_v36  ;;  %v2486_v39 = vunpack.i.l.bf16 %v2485_v36  ;;  %644 = vmatpush.msrb.mxu1 %v2979_v25  ;;  %v3000_v36 = vld [vmem:[%s3489_s7 + $0x30] sm:$0xff] }
 0x104   :  { %v291_v5 = vpack.c.bf16 %v2517_v59, %v2516_v60  ;;  %665 = vmatpush.msrb.mxu2 %v2979_v25 }
 0x105   :  { %v273_v22 = vsel %vm270_vm4, %v2793_v28, %v2486_v39  ;;  %v274_v45 = vsel %vm270_vm4, %v2795_v29, %v2487_v38  ;;  %v2526_v29 = vunpack.i.l.bf16 %v2525_v51  ;;  %645 = vmatpush.msrb.mxu1 %v2986_v30  ;;  %v3014_v38 = vld [vmem:[%s3489_s7 + $0x20] sm:$0xff]  ;;  %v33_v39 = vld [vmem:[%s3489_s7 + $0x18] sm:$0xff] }
 0x106   :  { %v292_v52 = vpack.c.bf16 %v274_v45, %v273_v22  ;;  %666 = vmatpush.msrb.mxu2 %v2986_v30 }
 0x107   :  { %646 = vmatpush.msrb.mxu1 %v2993_v35 }
 0x108   :  { %667 = vmatpush.msrb.mxu2 %v2993_v35 }
 0x109   :  { %v2530_v40 = vpop.permute.xlu0 %2529  ;;  %647 = vmatpush.msrb.mxu1 %v3000_v36 }
 0x10a   :  { %v2532_v42 = vunpack.i.h.bf16 %v2530_v40  ;;  %v2531_v15 = vunpack.i.l.bf16 %v2530_v40  ;;  %v2505_v43 = vpop.permute.xlu1 %2504  ;;  %668 = vmatpush.msrb.mxu2 %v3000_v36 }
 0x10b   :  { %v2507_v44 = vunpack.i.h.bf16 %v2505_v43  ;;  %v2506_v19 = vunpack.i.l.bf16 %v2505_v43  ;;  %648 = vmatpush.msrb.mxu1 %v3007_v37  ;;  %v31_v43 = vld [vmem:[%s3489_s7 + $0x8] sm:$0xff] }
 0x10c   :  { %v285_v46 = vsel %vm270_vm4, %v2803_v32, %v2531_v15  ;;  %v286_v47 = vsel %vm270_vm4, %v2805_v33, %v2532_v42  ;;  %669 = vmatpush.msrb.mxu2 %v3007_v37 }
 0x10d   :  { %v275_v48 = vsel %vm270_vm4, %v2506_v19, %v2511_v41  ;;  %v276_v49 = vsel %vm270_vm4, %v2507_v44, %v2512_v17  ;;  %v295_v50 = vpack.c.bf16 %v286_v47, %v285_v46  ;;  %649 = vmatpush.msrb.mxu1 %v3014_v38  ;;  %v32_v41 = vld [vmem:[%s3489_s7 + $0x10] sm:$0xff]  ;;  %v30_v44 = vld [vmem:[%s3489_s7] sm:$0xff] }
 0x10e   :  { %v288_v53 = vpack.c.bf16 %v276_v49, %v275_v48  ;;  %670 = vmatpush.msrb.mxu2 %v3014_v38 }
 0x10f   :  { %589 = vmatmul.bf16.gmra.mxu3 %v295_v50  ;;  %650 = vmatpush.msrb.mxu1 %v33_v39 }
 0x110   :  { %532 = vmatmul.bf16.gmra.mxu0 %v292_v52  ;;  %546 = vmatmul.bf16.vlgmr.msra.gmra.mxu1 %v288_v53 }
 0x111   :  { %v2545_v7 = vpop.permute.xlu0 %2544  ;;  %671 = vmatpush.msrb.mxu2 %v33_v39  ;;  %651 = vmatpush.msrb.mxu1 %v32_v41 }
 0x112   :  { %v2520_v28 = vpop.permute.xlu1 %2519  ;;  %v2547_v8 = vunpack.i.h.bf16 %v2545_v7  ;;  %v2546_v9 = vunpack.i.l.bf16 %v2545_v7 }
 0x113   :  { %v2522_v55 = vunpack.i.h.bf16 %v2520_v28  ;;  %v2521_v56 = vunpack.i.l.bf16 %v2520_v28  ;;  %672 = vmatpush.msrb.mxu2 %v32_v41  ;;  %652 = vmatpush.msrb.mxu1 %v31_v43 }
 0x114   :  { %v296_v10 = vpack.c.bf16 %v2547_v8, %v2546_v9 }
 0x115   :  { %v281_v32 = vsel %vm270_vm4, %v2521_v56, %v2526_v29  ;;  %v282_v33 = vsel %vm270_vm4, %v2522_v55, %v2527_v54  ;;  %673 = vmatpush.msrb.mxu2 %v31_v43  ;;  %653 = vmatpush.msrb.mxu1 %v30_v44 }
 0x116   :  { %v294_v57 = vpack.c.bf16 %v282_v33, %v281_v32 }
 0x117   :  { %674 = vmatpush.msrb.mxu2 %v30_v44 }
 0x118   :  { %570 = vmatmul.bf16.gmra.mxu2 %v294_v57 }
 0x11a   :  { %v2535_v61 = vpop.permute.xlu1 %2534 }
 0x11b   :  { %v2537_v0 = vunpack.i.h.bf16 %v2535_v61  ;;  %v2536_v2 = vunpack.i.l.bf16 %v2535_v61 }
 0x11d   :  { %v277_v3 = vsel %vm270_vm4, %v2536_v2, %v2541_v63  ;;  %v278_v4 = vsel %vm270_vm4, %v2537_v0, %v2542_v62 }
 0x11e   :  { %v293_v6 = vpack.c.bf16 %v278_v4, %v277_v3 }
 0x120   :  { %551 = vmatmul.bf16.gmra.mxu1 %v293_v6  ;;  %2052 = vmatmul.msk.bf16.vlgmr.msrb.gmra.mxu0 %vm270_vm4, %v291_v5 }
 0x130   :  { %2053 = vmatmul.msk.bf16.gmra.mxu0 %vm270_vm4, %v296_v10  ;;  %vm996_vm4 = vcmask 1045504  }
 0x171   :  { %v566_v26 = vpop.f32.mrf.mxu2 }
 0x179   :  { %v568_v40 = vpop.f32.mrf.mxu2 }
 0x17d   :  { %v2932_v11 = vpop.f32.mrf.mxu0 }
 0x182   :  { %v585_v27 = vpop.f32.mrf.mxu3 }
 0x185   :  { %v530_v12 = vpop.f32.mrf.mxu0 }
 0x18a   :  { %v587_v42 = vpop.f32.mrf.mxu3 }
 0x18d   :  { %v533_v20 = vpop.f32.mrf.mxu0  ;;  %v547_v21 = vpop.f32.mrf.mxu1 }
 0x18e   :  { %v548_v46 = vadd.f32 %v547_v21, %v2932_v11 }
 0x190   :  { %v567_v51 = vadd.f32 %v566_v26, %v548_v46 }
 0x192   :  { %v590_v49 = vpop.f32.mrf.mxu3  ;;  %v586_v29 = vadd.f32 %v585_v27, %v567_v51 }
 0x195   :  { %v535_v31 = vpop.f32.mrf.mxu0  ;;  %v549_v34 = vpop.f32.mrf.mxu1 }
 0x196   :  { %v550_v19 = vadd.f32 %v549_v34, %v530_v12 }
 0x198   :  { %v569_v48 = vadd.f32 %v568_v40, %v550_v19 }
 0x19a   :  { %v588_v28 = vadd.f32 %v587_v42, %v569_v48  ;;  %v592_v60 = vpop.f32.mrf.mxu3 }
 0x19b   :  { %v571_v22 = vpop.f32.mrf.mxu2 }
 0x19d   :  { %v604_v17 = vpop.f32.mrf.mxu0  ;;  %v552_v15 = vpop.f32.mrf.mxu1 }
 0x19e   :  { %v553_v47 = vadd.f32 %v552_v15, %v533_v20  ;;  %v3033_v33 = vadd.f32 %v604_v17, %v586_v29 }
 0x1a0   :  { %v572_v52 = vadd.f32 %v571_v22, %v553_v47  ;;  %v625_v61 = vmul.f32 %v3033_v33, %v3033_v33 }
 0x1a2   :  { %v591_v56 = vadd.f32 %v590_v49, %v572_v52 }
 0x1a3   :  { %v573_v32 = vpop.f32.mrf.mxu2 }
 0x1a5   :  { %v606_v45 = vpop.f32.mrf.mxu0  ;;  %v554_v50 = vpop.f32.mrf.mxu1 }
 0x1a6   :  { %v555_v53 = vadd.f32 %v554_v50, %v535_v31  ;;  %v3031_v55 = vadd.f32 %v606_v45, %v588_v28  ;;  %v614_v50 = vld [vmem:[%s3490_s2] sm:$0x1]  ;;  %s2695_s2 = smov 8  }
 0x1a7   :  { %v615_v28 = vld [vmem:[%s3491_s3] sm:$0x1] }
 0x1a8   :  { %v574_v57 = vadd.f32 %v573_v32, %v555_v53  ;;  %v626_v59 = vmul.f32 %v3031_v55, %v3031_v55  ;;  %v616_v62 = vadd.f32 %v3031_v55, %v3033_v33 }
 0x1aa   :  { %v593_v0 = vadd.f32 %v592_v60, %v574_v57  ;;  %v629_v3 = vadd.f32 %v626_v59, %v625_v61 }
 0x1ad   :  { %v609_v54 = vpop.f32.mrf.mxu0 }
 0x1ae   :  { %v3035_v58 = vadd.f32 %v609_v54, %v591_v56 }
 0x1b0   :  { %v627_v63 = vmul.f32 %v3035_v58, %v3035_v58  ;;  %v617_v4 = vadd.f32 %v616_v62, %v3035_v58 }
 0x1b2   :  { %v630_v6 = vadd.f32 %v629_v3, %v627_v63 }
 0x1b5   :  { %v611_v2 = vpop.f32.mrf.mxu0 }
 0x1b6   :  { %v612_v5 = vadd.f32 %v611_v2, %v593_v0 }
 0x1b8   :  { %v618_v7 = vadd.f32 %v617_v4, %v612_v5  ;;  %v628_v8 = vmul.f32 %v612_v5, %v612_v5 }
 0x1ba   :  { %v619_v9 = vrot.slane %v618_v7, 4  ;;  %v631_v10 = vadd.f32 %v630_v6, %v628_v8 }
 0x1bc   :  { %v620_v11 = vadd.f32 %v619_v9, %v618_v7  ;;  %v632_v12 = vrot.slane %v631_v10, 4 }
 0x1be   :  { %v621_v20 = vrot.slane %v620_v11, 2  ;;  %v633_v21 = vadd.f32 %v632_v12, %v631_v10  ;;  %v2384_v12 = vld [vmem:[%s3492_s4 + $0x30] sm:$0xff] }
 0x1c0   :  { %v622_v26 = vadd.f32 %v621_v20, %v620_v11  ;;  %v634_v27 = vrot.slane %v633_v21, 2  ;;  %v2409_v11 = vld [vmem:[%s3492_s4 + $0xf8] sm:$0xff]  ;;  %v2408_v20 = vld [vmem:[%s3492_s4 + $0xf0] sm:$0xff] }
 0x1c1   :  { %1686 = vmatpush.bf16.msra.mxu2 %v2409_v11 }
 0x1c2   :  { %v623_v31 = vrot.slane %v622_v26, 1  ;;  %v635_v34 = vadd.f32 %v634_v27, %v633_v21  ;;  %v2383_v21 = vld [vmem:[%s3492_s4 + $0x28] sm:$0xff]  ;;  %v2382_v27 = vld [vmem:[%s3492_s4 + $0x20] sm:$0xff] }
 0x1c4   :  { %v624_v39 = vadd.f32 %v623_v31, %v622_v26  ;;  %v636_v40 = vrot.slane %v635_v34, 1  ;;  %v2407_v26 = vld [vmem:[%s3492_s4 + $0xe8] sm:$0xff]  ;;  %v2406_v31 = vld [vmem:[%s3492_s4 + $0xe0] sm:$0xff] }
 0x1c5   :  { %1687 = vmatpush.bf16.msra.mxu2 %v2408_v20 }
 0x1c6   :  { %654 = vmatmul.f32.vlgmr.msrb.gmra.mxu1 %v624_v39  ;;  %v637_v17 = vadd.f32 %v636_v40, %v635_v34  ;;  %v2381_v34 = vld [vmem:[%s3492_s4 + $0x18] sm:$0xff]  ;;  %v2380_v40 = vld [vmem:[%s3492_s4 + $0x10] sm:$0xff] }
 0x1c7   :  { %v2405_v39 = vld [vmem:[%s3492_s4 + $0xd8] sm:$0xff] }
 0x1c8   :  { %675 = vmatmul.f32.vlgmr.msrb.gmra.mxu2 %v637_v17  ;;  %v714_v17 = vlaneseq }
 0x1c9   :  { %1688 = vmatpush.bf16.msra.mxu2 %v2407_v26 }
 0x1ca   :  { %vm716_vm15 = vcmp.lt.s32.totalorder %v714_v17, 144 }
 0x1cb   :  { %718 = vst.msk [vmem:[#allocation3] ss:$8 sm:$0x3] %vm716_vm15, %v2688_v1 }
 0x1cc   :  { %721 = vst.msk [vmem:[#allocation3 + $0x30] ss:$8 sm:$0x3] %vm716_vm15, %v2688_v1 }
 0x1cd   :  { %1689 = vmatpush.bf16.msra.mxu2 %v2406_v31  ;;  %724 = vst.msk [vmem:[#allocation3 + $0x21] ss:$8 sm:$0x3] %vm716_vm15, %v2688_v1 }
 0x1ce   :  { %727 = vst.msk [vmem:[#allocation3 + $0x51] ss:$8 sm:$0x3] %vm716_vm15, %v2688_v1 }
 0x1d1   :  { %1690 = vmatpush.bf16.msra.mxu2 %v2405_v39 }
 0x243   :  { %v655_v41 = vpop.f32.mrf.mxu1 }
 0x244   :  { %v658_v42 = vmul.f32 0.001953125, %v655_v41  ;;  %v2404_v41 = vld [vmem:[%s3492_s4 + $0xd0] sm:$0xff] }
 0x245   :  { %1691 = vmatpush.bf16.msra.mxu2 %v2404_v41 }
 0x246   :  { %v680_v43 = vmul.f32 %v658_v42, %v658_v42 }
 0x24b   :  { %v676_v15 = vpop.f32.mrf.mxu2 }
 0x24c   :  { %v679_v44 = vmul.f32 0.001953125, %v676_v15  ;;  %v2403_v15 = vld [vmem:[%s3492_s4 + $0xc8] sm:$0xff] }
 0x24d   :  { %1692 = vmatpush.bf16.msra.mxu2 %v2403_v15 }
 0x24e   :  { %v681_v19 = vsub.f32 %v679_v44, %v680_v43  ;;  %v2378_v43 = vld [vmem:[%s3492_s4] sm:$0xff] }
 0x250   :  { %v682_v22 = vadd.f32 1e-05, %v681_v19  ;;  %v2402_v19 = vld [vmem:[%s3492_s4 + $0xc0] sm:$0xff] }
 0x251   :  { %1693 = vmatpush.bf16.msra.mxu2 %v2402_v19 }
 0x252   :  { %2668 = vrsqrt.f32 %v682_v22  ;;  %vm689_vm8 = vweird.f32 %v682_v22 }
 0x258   :  { %v2669_v45 = vpop.eup %2668 }
 0x259   :  { %v684_v46 = vmul.f32 %v2669_v45, %v682_v22  ;;  %vm690_vm7 = vweird.f32 %v2669_v45 }
 0x25a   :  { %vm691_vm9 = vmor %vm689_vm8, %vm690_vm7 }
 0x25b   :  { %v685_v47 = vmul.f32 %v2669_v45, %v684_v46 }
 0x25d   :  { %v686_v48 = vmul.f32 0.5, %v685_v47 }
 0x25f   :  { %v687_v49 = vsub.f32 1.5, %v686_v48 }
 0x261   :  { %v688_v51 = vmul.f32 %v2669_v45, %v687_v49 }
 0x263   :  { %v692_v52 = vsel %vm691_vm9, %v2669_v45, %v688_v51 }
 0x264   :  { %v693_v53 = vmul.f32 %v692_v52, %v614_v50 }
 0x266   :  { %v694_v54 = vmul.f32 %v693_v53, %v658_v42  ;;  %v697_v29 = vperm.slane %v693_v53, 0  ;;  %v2379_v42 = vld [vmem:[%s3492_s4 + $0x8] sm:$0xff] }
 0x268   :  { %v695_v56 = vsub.f32 %v615_v28, %v694_v54  ;;  %v700_v32 = vmul.f32 %v697_v29, %v3031_v55  ;;  %v699_v59 = vmul.f32 %v697_v29, %v3033_v33  ;;  %v702_v62 = vmul.f32 %v697_v29, %v612_v5 }
 0x269   :  { %v701_v63 = vmul.f32 %v697_v29, %v3035_v58  ;;  %v2385_v58 = vld [vmem:[%s3492_s4 + $0x38] sm:$0xff] }
 0x26a   :  { %v704_v57 = vperm.slane %v695_v56, 0  ;;  %1629 = vmatpush.bf16.msrb.mxu3 %v2385_v58 }
 0x26c   :  { %v707_v60 = vadd.f32 %v704_v57, %v700_v32  ;;  %v706_v61 = vadd.f32 %v704_v57, %v699_v59  ;;  %v709_v3 = vadd.f32 %v704_v57, %v702_v62  ;;  %v708_v4 = vadd.f32 %v704_v57, %v701_v63 }
 0x26e   :  { %v711_v0 = vmax.f32 %v707_v60, 0.0  ;;  %v710_v2 = vmax.f32 %v706_v61, 0.0  ;;  %v713_v55 = vmax.f32 %v709_v3, 0.0  ;;  %v712_v9 = vmax.f32 %v708_v4, 0.0  ;;  %1630 = vmatpush.bf16.msrb.mxu3 %v2384_v12 }
 0x270   :  { %v753_v6 = vrot.slane %v711_v0, 7  ;;  %v752_v7 = vrot.slane %v710_v2, 7  ;;  %v756_v33 = vrot.slane %v713_v55, 7  ;;  %v755_v10 = vrot.slane %v712_v9, 7 }
 0x272   :  { %762 = vrot.lane.b32.xlu0 %v753_v6, %s2695_s2  ;;  %758 = vrot.lane.b32.xlu1 %v752_v7, %s2695_s2  ;;  %v754_v8 = vsel %vm751_vm10, %v752_v7, %v753_v6  ;;  %v757_v5 = vsel %vm751_vm10, %v755_v10, %v756_v33 }
 0x273   :  { %760 = vrot.lane.b32.xlu2 %v754_v8, %s2695_s2  ;;  %1631 = vmatpush.bf16.msrb.mxu3 %v2383_v21 }
 0x277   :  { %1632 = vmatpush.bf16.msrb.mxu3 %v2382_v27 }
 0x27a   :  { %768 = vrot.lane.b32.xlu0 %v756_v33, %s2695_s2  ;;  %764 = vrot.lane.b32.xlu1 %v755_v10, %s2695_s2 }
 0x27b   :  { %766 = vrot.lane.b32.xlu2 %v757_v5, %s2695_s2  ;;  %1633 = vmatpush.bf16.msrb.mxu3 %v2381_v34 }
 0x27f   :  { %1634 = vmatpush.bf16.msrb.mxu3 %v2380_v40 }
 0x283   :  { %1635 = vmatpush.bf16.msrb.mxu3 %v2379_v42 }
 0x287   :  { %1636 = vmatpush.bf16.msrb.mxu3 %v2378_v43 }
 0x2cd   :  { %v761_v44 = vpop.permute.xlu2 %760 }
 0x2ce   :  { %780 = vst.msk [vmem:[#allocation3 + $0x10] sm:$0xff] %vm779_vm0, %v761_v44 }
 0x2cf   :  { %781 = vst.msk [vmem:[#allocation3 + $0x18] sm:$0xff] %vm731_vm5, %v761_v44 }
 0x2d5   :  { %v767_v22 = vpop.permute.xlu2 %766  ;;  %v936_v45 = vld [vmem:[#allocation3 + $0x10] sm:$0xff] }
 0x2d6   :  { %787 = vst.msk [vmem:[#allocation3 + $0x40] sm:$0xff] %vm779_vm0, %v767_v22  ;;  %v3126_v46 = vld [vmem:[#allocation3 + $0x18] sm:$0xff]  ;;  %v955_v53 = vrot.slane %v936_v45, 1  ;;  %v998_v6 = vrot.slane %v936_v45, 2 }
 0x2d7   :  { %788 = vst.msk [vmem:[#allocation3 + $0x48] sm:$0xff] %vm731_vm5, %v767_v22  ;;  %v3130_v1 = vpack.i.bf16 %v3126_v46, %v936_v45  ;;  %v979_v2 = vrot.slane %v3126_v46, 1  ;;  %vm1074_vm5 = vcmask 916480  }
 0x2d9   :  { %2564 = vrot.lane.b32.xlu0 %v3130_v1, %s2696_s15 }
 0x2dd   :  { %v938_v5 = vld [vmem:[#allocation3 + $0x40] sm:$0xff] }
 0x2de   :  { %v1003_v26 = vrot.slane %v938_v5, 2  ;;  %v3158_v34 = vld [vmem:[#allocation3 + $0x48] sm:$0xff] }
 0x2df   :  { %v2593_v15 = vpack.i.bf16 %v3158_v34, %v938_v5 }
 0x2e4   :  { %v763_v47 = vpop.permute.xlu0 %762  ;;  %v759_v48 = vpop.permute.xlu1 %758 }
 0x2e5   :  { %783 = vst.msk [vmem:[#allocation3 + $0x20] sm:$0x1] %vm782_vm1, %v763_v47 }
 0x2e6   :  { %784 = vst.msk [vmem:[#allocation3 + $0x28] sm:$0x1] %vm733_vm11, %v763_v47 }
 0x2e7   :  { %777 = vst.msk [vmem:[#allocation3] sm:$0xfe] %vm776_vm2, %v759_v48 }
 0x2e8   :  { %778 = vst.msk [vmem:[#allocation3 + $0x8] sm:$0xfe] %vm729_vm13, %v759_v48 }
 0x2ec   :  { %v769_v49 = vpop.permute.xlu0 %768  ;;  %v765_v50 = vpop.permute.xlu1 %764  ;;  %v944_v51 = vld [vmem:[#allocation3 + $0x20] sm:$0x1] }
 0x2ed   :  { %v989_v52 = vld [vmem:[#allocation3 + $0x20] sm:$0x3]  ;;  %789 = vst.msk [vmem:[#allocation3 + $0x50] sm:$0x1] %vm782_vm1, %v769_v49  ;;  %v957_v28 = vrot.slane %v944_v51, 1 }
 0x2ee   :  { %v969_v54 = vld [vmem:[#allocation3 + $0x28] sm:$0x1]  ;;  %790 = vst.msk [vmem:[#allocation3 + $0x58] sm:$0x1] %vm733_vm11, %v769_v49  ;;  %v935_v29 = vld [vmem:[#allocation3] sm:$0xff]  ;;  %v1000_v32 = vrot.slane %v989_v52, 2 }
 0x2ef   :  { %v943_v56 = vld [vmem:[#allocation3] sm:$0xfe]  ;;  %785 = vst.msk [vmem:[#allocation3 + $0x30] sm:$0xfe] %vm776_vm2, %v765_v50  ;;  %v939_v57 = vld [vmem:[#allocation3 + $0x8] sm:$0xff]  ;;  %v1179_v59 = vpack.c.bf16 %v936_v45, %v935_v29  ;;  %v958_v62 = vsel %vm953_vm3, %v955_v53, %v957_v28  ;;  %v981_v4 = vrot.slane %v969_v54, 1 }
 0x2f0   :  { %v954_v60 = vrot.slane %v943_v56, 1  ;;  %v968_v61 = vld [vmem:[#allocation3 + $0x8] sm:$0xfe]  ;;  %786 = vst.msk [vmem:[#allocation3 + $0x38] sm:$0xfe] %vm729_vm13, %v765_v50  ;;  %v2548_v63 = vpack.i.bf16 %v939_v57, %v935_v29  ;;  %v3147_v10 = vsel %vm996_vm4, %v998_v6, %v1000_v32  ;;  %v960_v49 = vrot.slane %v938_v5, 1 }
 0x2f1   :  { %v978_v0 = vrot.slane %v968_v61, 1  ;;  %1637 = vmatmul.bf16.vlgmr.msrb.gmra.mxu3 %v1179_v59  ;;  %v988_v7 = vld [vmem:[#allocation3] sm:$0xfc]  ;;  %v982_v12 = vsel %vm953_vm3, %v979_v2, %v981_v4  ;;  %v1012_v59 = vld [vmem:[#allocation3 + $0x28] sm:$0x3] }
 0x2f2   :  { %v956_v3 = vsel %vm953_vm3, %v954_v60, %v955_v53  ;;  %2549 = vrot.lane.b32.xlu1 %v2548_v63, %s2692_s21  ;;  %2554 = vrot.lane.b32.xlu2 %v2548_v63, %s2696_s15  ;;  %v997_v9 = vrot.slane %v988_v7, 2  ;;  %v3156_v31 = vpack.i.bf16 %v982_v12, %v958_v62  ;;  %v1011_v60 = vld [vmem:[#allocation3 + $0x8] sm:$0xfc] }
 0x2f3   :  { %v980_v8 = vsel %vm953_vm3, %v978_v0, %v979_v2  ;;  %v1182_v55 = vpack.c.bf16 %v958_v62, %v956_v3  ;;  %v1022_v62 = vrot.slane %v1012_v59, 2  ;;  %v1019_v63 = vrot.slane %v1011_v60, 2  ;;  %v2401_v0 = vld [vmem:[%s3492_s4 + $0xb8] sm:$0xff] }
 0x2f4   :  { %v2568_v33 = vpack.i.bf16 %v980_v8, %v956_v3  ;;  %v3150_v58 = vsel %vm996_vm4, %v997_v9, %v998_v6  ;;  %v991_v11 = vld [vmem:[#allocation3 + $0x50] sm:$0x3]  ;;  %v1020_v2 = vrot.slane %v3126_v46, 2  ;;  %1667 = vmatpush.bf16.msra.mxu1 %v2401_v0  ;;  %v2400_v3 = vld [vmem:[%s3492_s4 + $0xb0] sm:$0xff]  ;;  %v2393_v4 = vld [vmem:[%s3492_s4 + $0x78] sm:$0xff] }
 0x2f5   :  { %1694 = vmatmul.bf16.vlgmr.msra.gmra.mxu2 %v1182_v55  ;;  %v1005_v20 = vrot.slane %v991_v11, 2  ;;  %v1185_v21 = vpack.c.bf16 %v3147_v10, %v3150_v58  ;;  %v946_v40 = vld [vmem:[#allocation3 + $0x50] sm:$0x1]  ;;  %v971_v50 = vld [vmem:[#allocation3 + $0x58] sm:$0x1]  ;;  %1648 = vmatpush.bf16.msra.mxu0 %v2393_v4  ;;  %v2397_v11 = vld [vmem:[%s3492_s4 + $0x98] sm:$0xff] }
 0x2f6   :  { %2569 = vrot.lane.b32.xlu0 %v2568_v33, %s2692_s21  ;;  %v990_v27 = vld [vmem:[#allocation3 + $0x30] sm:$0xfc]  ;;  %v962_v44 = vrot.slane %v946_v40, 1  ;;  %v986_v29 = vrot.slane %v971_v50, 1  ;;  %v1023_v6 = vsel %vm996_vm4, %v1020_v2, %v1022_v62  ;;  %v1021_v7 = vsel %vm996_vm4, %v1019_v63, %v1020_v2  ;;  %v2399_v55 = vld [vmem:[%s3492_s4 + $0xa8] sm:$0xff]  ;;  %v2388_v50 = vld [vmem:[%s3492_s4 + $0x50] sm:$0xff] }
 0x2f7   :  { %v945_v39 = vld [vmem:[#allocation3 + $0x30] sm:$0xfe]  ;;  %v970_v17 = vld [vmem:[#allocation3 + $0x38] sm:$0xfe]  ;;  %v3161_v41 = vsel %vm996_vm4, %v1003_v26, %v1005_v20  ;;  %v1002_v42 = vrot.slane %v990_v27, 2  ;;  %v2613_v8 = vpack.i.bf16 %v1023_v6, %v3147_v10  ;;  %v2608_v46 = vpack.i.bf16 %v1021_v7, %v3150_v58  ;;  %v2396_v27 = vld [vmem:[%s3492_s4 + $0x90] sm:$0xff] }
 0x2f8   :  { %v959_v43 = vrot.slane %v945_v39, 1  ;;  %v937_v22 = vld [vmem:[#allocation3 + $0x30] sm:$0xff]  ;;  %v983_v45 = vrot.slane %v970_v17, 1  ;;  %v941_v48 = vld [vmem:[#allocation3 + $0x38] sm:$0xff]  ;;  %v963_v53 = vsel %vm953_vm3, %v960_v49, %v962_v44  ;;  %1668 = vmatpush.bf16.msra.mxu1 %v2400_v3  ;;  %v2440_v6 = vld [vmem:[%s3492_s4 + $0x1f0] sm:$0xff] }
 0x2f9   :  { %v3169_v19 = vsel %vm996_vm4, %v1002_v42, %v1003_v26  ;;  %v1188_v51 = vpack.c.bf16 %v938_v5, %v937_v22  ;;  %v2578_v28 = vpack.i.bf16 %v941_v48, %v937_v22  ;;  %v2398_v9 = vld [vmem:[%s3492_s4 + $0xa0] sm:$0xff]  ;;  %v1013_v5 = vld [vmem:[#allocation3 + $0x38] sm:$0xfc]  ;;  %v1025_v26 = vrot.slane %v3158_v34, 2  ;;  %v2416_v22 = vld [vmem:[%s3492_s4 + $0x130] sm:$0xff] }
 0x2fa   :  { %2559 = vrot.lane.b32.xlu2 %v3130_v1, %s2692_s21  ;;  %2574 = vrot.lane.b32.xlu1 %v3156_v31, %s2692_s21  ;;  %v1194_v47 = vpack.c.bf16 %v3161_v41, %v3169_v19  ;;  %v984_v1 = vrot.slane %v3158_v34, 1  ;;  %v961_v52 = vsel %vm953_vm3, %v959_v43, %v960_v49  ;;  %v1024_v20 = vrot.slane %v1013_v5, 2  ;;  %v2392_v34 = vld [vmem:[%s3492_s4 + $0x70] sm:$0xff]  ;;  %v2417_v43 = vld [vmem:[%s3492_s4 + $0x138] sm:$0xff] }
 0x2fb   :  { %v1191_v56 = vpack.c.bf16 %v963_v53, %v961_v52  ;;  %1649 = vmatpush.bf16.msra.mxu0 %v2392_v34  ;;  %v2391_v44 = vld [vmem:[%s3492_s4 + $0x68] sm:$0xff]  ;;  %1705 = vmatpush.bf16.msra.mxu3 %v2417_v43  ;;  %v2389_v49 = vld [vmem:[%s3492_s4 + $0x58] sm:$0xff]  ;;  %v2410_v4 = vld [vmem:[%s3492_s4 + $0x100] sm:$0xff] }
 0x2fc   :  { %v985_v54 = vsel %vm953_vm3, %v983_v45, %v984_v1  ;;  %v987_v57 = vsel %vm953_vm3, %v984_v1, %v986_v29  ;;  %1669 = vmatpush.bf16.msra.mxu1 %v2399_v55  ;;  %v1026_v40 = vsel %vm996_vm4, %v1024_v20, %v1025_v26  ;;  %v2390_v45 = vld [vmem:[%s3492_s4 + $0x60] sm:$0xff]  ;;  %v2415_v48 = vld [vmem:[%s3492_s4 + $0x128] sm:$0xff]  ;;  %v2449_v55 = vld [vmem:[%s3492_s4 + $0x238] sm:$0xff] }
 0x2fd   :  { %v2598_v32 = vpack.i.bf16 %v985_v54, %v961_v52  ;;  %v2603_v61 = vpack.i.bf16 %v987_v57, %v963_v53  ;;  %v2638_v42 = vpack.i.bf16 %v1026_v40, %v3169_v19  ;;  %v2414_v1 = vld [vmem:[%s3492_s4 + $0x120] sm:$0xff]  ;;  %v2387_v52 = vld [vmem:[%s3492_s4 + $0x48] sm:$0xff]  ;;  %v2433_v53 = vld [vmem:[%s3492_s4 + $0x1b8] sm:$0xff] }
 0x2fe   :  { %2594 = vrot.lane.b32.xlu0 %v2593_v15, %s2696_s15  ;;  %v2386_v54 = vld [vmem:[%s3492_s4 + $0x40] sm:$0xff]  ;;  %v2411_v29 = vld [vmem:[%s3492_s4 + $0x108] sm:$0xff]  ;;  %v2437_v40 = vld [vmem:[%s3492_s4 + $0x1d8] sm:$0xff] }
 0x2ff   :  { %1650 = vmatpush.bf16.msra.mxu0 %v2391_v44  ;;  %1706 = vmatpush.bf16.msra.mxu3 %v2416_v22  ;;  %v2431_v2 = vld [vmem:[%s3492_s4 + $0x1a8] sm:$0xff]  ;;  %v2438_v20 = vld [vmem:[%s3492_s4 + $0x1e0] sm:$0xff]  ;;  %v2436_v34 = vld [vmem:[%s3492_s4 + $0x1d0] sm:$0xff] }
 0x300   :  { %1670 = vmatpush.bf16.msra.mxu1 %v2398_v9  ;;  %v2439_v9 = vld [vmem:[%s3492_s4 + $0x1e8] sm:$0xff]  ;;  %v2421_v43 = vld [vmem:[%s3492_s4 + $0x158] sm:$0xff]  ;;  %v2426_v44 = vld [vmem:[%s3492_s4 + $0x180] sm:$0xff] }
 0x301   :  { %1642 = vmatmul.bf16.gmra.mxu3 %v1188_v51  ;;  %v2413_v51 = vld [vmem:[%s3492_s4 + $0x118] sm:$0xff]  ;;  %v2685_v10 = vld [vmem:[%s3489_s7 + $0x30] sm:$0xff] }
 0x302   :  { %2579 = vrot.lane.b32.xlu1 %v2578_v28, %s2692_s21  ;;  %2584 = vrot.lane.b32.xlu2 %v2593_v15, %s2692_s21  ;;  %v2394_v15 = vld [vmem:[%s3492_s4 + $0x80] sm:$0xff]  ;;  %v2445_v22 = vld [vmem:[%s3492_s4 + $0x218] sm:$0xff] }
 0x303   :  { %1651 = vmatpush.bf16.msra.mxu0 %v2390_v45  ;;  %1707 = vmatpush.bf16.msra.mxu3 %v2415_v48 }
 0x304   :  { %1671 = vmatpush.bf16.msra.mxu1 %v2397_v11  ;;  %v2424_v11 = vld [vmem:[%s3492_s4 + $0x170] sm:$0xff] }
 0x305   :  { %1699 = vmatmul.bf16.gmra.mxu2 %v1191_v56  ;;  %v2432_v56 = vld [vmem:[%s3492_s4 + $0x1b0] sm:$0xff] }
 0x306   :  { %2599 = vrot.lane.b32.xlu0 %v2598_v32, %s2692_s21 }
 0x307   :  { %1652 = vmatpush.bf16.msra.mxu0 %v2389_v49  ;;  %1708 = vmatpush.bf16.msra.mxu3 %v2414_v1  ;;  %v2435_v49 = vld [vmem:[%s3492_s4 + $0x1c8] sm:$0xff] }
 0x308   :  { %1672 = vmatpush.bf16.msra.mxu1 %v2396_v27  ;;  %v2428_v27 = vld [vmem:[%s3492_s4 + $0x190] sm:$0xff] }
 0x30a   :  { %2589 = vrot.lane.b32.xlu2 %v2578_v28, %s2696_s15  ;;  %2604 = vrot.lane.b32.xlu1 %v2603_v61, %s2692_s21  ;;  %v2412_v28 = vld [vmem:[%s3492_s4 + $0x110] sm:$0xff] }
 0x30b   :  { %1653 = vmatpush.bf16.msra.mxu0 %v2388_v50  ;;  %1709 = vmatpush.bf16.msra.mxu3 %v2413_v51 }
 0x30e   :  { %2619 = vrot.lane.b32.xlu0 %v2568_v33, %s2696_s15  ;;  %v1014_v33 = vld [vmem:[#allocation3 + $0x58] sm:$0x3] }
 0x30f   :  { %v1027_v12 = vrot.slane %v1014_v33, 2  ;;  %1654 = vmatpush.bf16.msra.mxu0 %v2387_v52  ;;  %1710 = vmatpush.bf16.msra.mxu3 %v2412_v28  ;;  %v2429_v33 = vld [vmem:[%s3492_s4 + $0x198] sm:$0xff] }
 0x311   :  { %v1028_v39 = vsel %vm996_vm4, %v1025_v26, %v1027_v12  ;;  %v2448_v12 = vld [vmem:[%s3492_s4 + $0x230] sm:$0xff]  ;;  %v2423_v26 = vld [vmem:[%s3492_s4 + $0x168] sm:$0xff] }
 0x312   :  { %2614 = vrot.lane.b32.xlu2 %v2613_v8, %s2692_s21  ;;  %2609 = vrot.lane.b32.xlu1 %v2608_v46, %s2692_s21  ;;  %v2643_v17 = vpack.i.bf16 %v1028_v39, %v3161_v41  ;;  %v2447_v39 = vld [vmem:[%s3492_s4 + $0x228] sm:$0xff] }
 0x313   :  { %1655 = vmatpush.bf16.msra.mxu0 %v2386_v54  ;;  %1711 = vmatpush.bf16.msra.mxu3 %v2411_v29  ;;  %v2420_v29 = vld [vmem:[%s3492_s4 + $0x150] sm:$0xff] }
 0x316   :  { %2634 = vrot.lane.b32.xlu0 %v2613_v8, %s2696_s15  ;;  %v2425_v8 = vld [vmem:[%s3492_s4 + $0x178] sm:$0xff] }
 0x317   :  { %1712 = vmatpush.bf16.msra.mxu3 %v2410_v4  ;;  %1724 = vmatpush.bf16.msrb.mxu0 %v2425_v8 }
 0x31a   :  { %2629 = vrot.lane.b32.xlu2 %v2608_v46, %s2696_s15  ;;  %2624 = vrot.lane.b32.xlu1 %v3156_v31, %s2696_s15  ;;  %v2395_v31 = vld [vmem:[%s3492_s4 + $0x88] sm:$0xff]  ;;  %v2430_v46 = vld [vmem:[%s3492_s4 + $0x1a0] sm:$0xff] }
 0x31b   :  { %1673 = vmatpush.bf16.msra.mxu1 %v2395_v31  ;;  %1781 = vmatpush.bf16.msrb.mxu3 %v2449_v55  ;;  %v2446_v31 = vld [vmem:[%s3492_s4 + $0x220] sm:$0xff] }
 0x31c   :  { %1725 = vmatpush.bf16.msrb.mxu0 %v2424_v11  ;;  %v2442_v55 = vld [vmem:[%s3492_s4 + $0x200] sm:$0xff] }
 0x31e   :  { %2649 = vrot.lane.b32.xlu0 %v2598_v32, %s2696_s15  ;;  %v2441_v32 = vld [vmem:[%s3492_s4 + $0x1f8] sm:$0xff] }
 0x31f   :  { %1674 = vmatpush.bf16.msra.mxu1 %v2394_v15  ;;  %1762 = vmatpush.bf16.msrb.mxu2 %v2441_v32  ;;  %v2434_v32 = vld [vmem:[%s3492_s4 + $0x1c0] sm:$0xff] }
 0x320   :  { %1782 = vmatpush.bf16.msrb.mxu3 %v2448_v12  ;;  %1726 = vmatpush.bf16.msrb.mxu0 %v2423_v26 }
 0x322   :  { %2644 = vrot.lane.b32.xlu2 %v2643_v17, %s2692_s21  ;;  %2639 = vrot.lane.b32.xlu1 %v2638_v42, %s2692_s21 }
 0x323   :  { %1743 = vmatpush.bf16.msrb.mxu1 %v2433_v53  ;;  %1763 = vmatpush.bf16.msrb.mxu2 %v2440_v6 }
 0x324   :  { %1783 = vmatpush.bf16.msrb.mxu3 %v2447_v39 }
 0x326   :  { %2664 = vrot.lane.b32.xlu0 %v2643_v17, %s2696_s15  ;;  %v2422_v17 = vld [vmem:[%s3492_s4 + $0x160] sm:$0xff] }
 0x327   :  { %1744 = vmatpush.bf16.msrb.mxu1 %v2432_v56  ;;  %1764 = vmatpush.bf16.msrb.mxu2 %v2439_v9  ;;  %v2444_v56 = vld [vmem:[%s3492_s4 + $0x210] sm:$0xff] }
 0x328   :  { %1727 = vmatpush.bf16.msrb.mxu0 %v2422_v17  ;;  %1784 = vmatpush.bf16.msrb.mxu3 %v2446_v31 }
 0x32a   :  { %2659 = vrot.lane.b32.xlu2 %v2638_v42, %s2696_s15  ;;  %2654 = vrot.lane.b32.xlu1 %v2603_v61, %s2696_s15  ;;  %v2427_v42 = vld [vmem:[%s3492_s4 + $0x188] sm:$0xff] }
 0x32b   :  { %1745 = vmatpush.bf16.msrb.mxu1 %v2431_v2  ;;  %1765 = vmatpush.bf16.msrb.mxu2 %v2438_v20  ;;  %v2672_v20 = vld [vmem:[%s3489_s7 + $0x78] sm:$0xff] }
 0x32c   :  { %1728 = vmatpush.bf16.msrb.mxu0 %v2421_v43  ;;  %1785 = vmatpush.bf16.msrb.mxu3 %v2445_v22 }
 0x32f   :  { %1746 = vmatpush.bf16.msrb.mxu1 %v2430_v46  ;;  %1766 = vmatpush.bf16.msrb.mxu2 %v2437_v40 }
 0x330   :  { %1786 = vmatpush.bf16.msrb.mxu3 %v2444_v56  ;;  %1729 = vmatpush.bf16.msrb.mxu0 %v2420_v29 }
 0x333   :  { %1747 = vmatpush.bf16.msrb.mxu1 %v2429_v33  ;;  %1767 = vmatpush.bf16.msrb.mxu2 %v2436_v34 }
 0x337   :  { %1748 = vmatpush.bf16.msrb.mxu1 %v2428_v27  ;;  %1768 = vmatpush.bf16.msrb.mxu2 %v2435_v49  ;;  %v2678_v49 = vld [vmem:[%s3489_s7 + $0x18] sm:$0xff] }
 0x33b   :  { %1749 = vmatpush.bf16.msrb.mxu1 %v2427_v42  ;;  %1769 = vmatpush.bf16.msrb.mxu2 %v2434_v32  ;;  %v2683_v32 = vld [vmem:[%s3489_s7 + $0x38] sm:$0xff] }
 0x33f   :  { %1750 = vmatpush.bf16.msrb.mxu1 %v2426_v44 }
 0x34b   :  { %v2565_v57 = vpop.permute.xlu0 %2564 }
 0x34c   :  { %v2555_v59 = vpop.permute.xlu2 %2554  ;;  %v2567_v60 = vunpack.i.h.bf16 %v2565_v57  ;;  %v2566_v61 = vunpack.i.l.bf16 %v2565_v57 }
 0x34d   :  { %v2557_v62 = vunpack.i.h.bf16 %v2555_v59  ;;  %v2556_v63 = vunpack.i.l.bf16 %v2555_v59 }
 0x34e   :  { %v1076_v0 = vsel %vm1074_vm5, %v2566_v61, %v2567_v60  ;;  %v2419_v60 = vld [vmem:[%s3492_s4 + $0x148] sm:$0xff] }
 0x34f   :  { %v1075_v3 = vsel %vm1074_vm5, %v2556_v63, %v2557_v62  ;;  %v2443_v61 = vld [vmem:[%s3492_s4 + $0x208] sm:$0xff]  ;;  %1730 = vmatpush.bf16.msrb.mxu0 %v2419_v60 }
 0x350   :  { %v1181_v7 = vpack.c.bf16 %v1076_v0, %v1075_v3  ;;  %1787 = vmatpush.bf16.msrb.mxu3 %v2443_v61 }
 0x352   :  { %1675 = vmatmul.bf16.vlgmr.msra.gmra.mxu1 %v1181_v7 }
 0x353   :  { %1845 = vmatpush.msra.mxu1 %v2937_v13 }
 0x354   :  { %v2560_v5 = vpop.permute.xlu2 %2559  ;;  %1788 = vmatpush.bf16.msrb.mxu3 %v2442_v55 }
 0x355   :  { %v2562_v45 = vunpack.i.h.bf16 %v2560_v5  ;;  %v2561_v48 = vunpack.i.l.bf16 %v2560_v5  ;;  %1846 = vmatpush.msra.mxu1 %v2944_v14 }
 0x357   :  { %v1051_v52 = vsel %vm1049_vm6, %v2561_v48, %v2562_v45  ;;  %1847 = vmatpush.msra.mxu1 %v2951_v16  ;;  %v2418_v16 = vld [vmem:[%s3492_s4 + $0x140] sm:$0xff]  ;;  %v2677_v48 = vld [vmem:[%s3489_s7 + $0x50] sm:$0xff] }
 0x358   :  { %1731 = vmatpush.bf16.msrb.mxu0 %v2418_v16 }
 0x359   :  { %1848 = vmatpush.msra.mxu1 %v2958_v18 }
 0x35b   :  { %1849 = vmatpush.msra.mxu1 %v2965_v23 }
 0x35c   :  { %v3344_v15 = vpop.permute.xlu2 %2584 }
 0x35d   :  { %1850 = vmatpush.msra.mxu1 %v2972_v24  ;;  %v2587_v33 = vunpack.i.h.bf16 %v3344_v15  ;;  %v2586_v5 = vunpack.i.l.bf16 %v3344_v15  ;;  %v2673_v24 = vld [vmem:[%s3489_s7 + $0x70] sm:$0xff] }
 0x35f   :  { %1851 = vmatpush.msra.mxu1 %v2979_v25  ;;  %v1053_v40 = vsel %vm1049_vm6, %v2586_v5, %v2587_v33  ;;  %v2674_v25 = vld [vmem:[%s3489_s7 + $0x68] sm:$0xff] }
 0x361   :  { %1852 = vmatpush.msra.mxu1 %v2986_v30  ;;  %v2675_v30 = vld [vmem:[%s3489_s7 + $0x60] sm:$0xff] }
 0x363   :  { %1853 = vmatpush.msra.mxu1 %v2993_v35  ;;  %v2676_v35 = vld [vmem:[%s3489_s7 + $0x58] sm:$0xff] }
 0x364   :  { %v2550_v1 = vpop.permute.xlu1 %2549  ;;  %v2590_v13 = vpop.permute.xlu2 %2589 }
 0x365   :  { %v2552_v50 = vunpack.i.h.bf16 %v2550_v1  ;;  %v2551_v51 = vunpack.i.l.bf16 %v2550_v1  ;;  %v2592_v0 = vunpack.i.h.bf16 %v2590_v13  ;;  %v2591_v2 = vunpack.i.l.bf16 %v2590_v13  ;;  %1854 = vmatpush.msra.mxu1 %v3000_v36  ;;  %v2680_v1 = vld [vmem:[%s3489_s7 + $0x10] sm:$0xff]  ;;  %v2684_v13 = vld [vmem:[%s3489_s7] sm:$0xff] }
 0x367   :  { %v1050_v53 = vsel %vm1049_vm6, %v2551_v51, %v2552_v50  ;;  %v1077_v18 = vsel %vm1074_vm5, %v2591_v2, %v2592_v0  ;;  %1855 = vmatpush.msra.mxu1 %v3007_v37 }
 0x368   :  { %v2570_v28 = vpop.permute.xlu0 %2569  ;;  %v1180_v54 = vpack.c.bf16 %v1051_v52, %v1050_v53  ;;  %v2681_v52 = vld [vmem:[%s3489_s7 + $0x40] sm:$0xff] }
 0x369   :  { %v2572_v57 = vunpack.i.h.bf16 %v2570_v28  ;;  %v2571_v59 = vunpack.i.l.bf16 %v2570_v28  ;;  %1856 = vmatpush.msra.mxu1 %v3014_v38  ;;  %v2679_v38 = vld [vmem:[%s3489_s7 + $0x48] sm:$0xff] }
 0x36a   :  { %1656 = vmatmul.bf16.vlgmr.msra.gmra.mxu0 %v1180_v54  ;;  %v2682_v54 = vld [vmem:[%s3489_s7 + $0x8] sm:$0xff] }
 0x36b   :  { %v1099_v3 = vsel %vm1049_vm6, %v2571_v59, %v2572_v57  ;;  %1824 = vmatpush.msra.mxu0 %v2672_v20  ;;  %1857 = vmatpush.msra.mxu1 %v2678_v49 }
 0x36c   :  { %v2575_v62 = vpop.permute.xlu1 %2574  ;;  %v2615_v42 = vpop.permute.xlu2 %2614 }
 0x36d   :  { %v2577_v63 = vunpack.i.h.bf16 %v2575_v62  ;;  %v2576_v14 = vunpack.i.l.bf16 %v2575_v62  ;;  %1825 = vmatpush.msra.mxu0 %v2673_v24  ;;  %1858 = vmatpush.msra.mxu1 %v2680_v1  ;;  %v2617_v50 = vunpack.i.h.bf16 %v2615_v42  ;;  %v2616_v51 = vunpack.i.l.bf16 %v2615_v42  ;;  %v2686_v62 = vld [vmem:[%s3489_s7 + $0x28] sm:$0xff] }
 0x36f   :  { %v1100_v4 = vsel %vm1049_vm6, %v2576_v14, %v2577_v63  ;;  %1826 = vmatpush.msra.mxu0 %v2674_v25  ;;  %1859 = vmatpush.msra.mxu1 %v2682_v54  ;;  %v1148_v57 = vsel %vm1049_vm6, %v2616_v51, %v2617_v50 }
 0x370   :  { %v2595_v6 = vpop.permute.xlu0 %2594  ;;  %v1183_v7 = vpack.c.bf16 %v1100_v4, %v1099_v3  ;;  %v2687_v3 = vld [vmem:[%s3489_s7 + $0x20] sm:$0xff] }
 0x371   :  { %v2597_v8 = vunpack.i.h.bf16 %v2595_v6  ;;  %v2596_v46 = vunpack.i.l.bf16 %v2595_v6  ;;  %1827 = vmatpush.msra.mxu0 %v2675_v30  ;;  %1860 = vmatpush.msra.mxu1 %v2684_v13 }
 0x372   :  { %1713 = vmatmul.bf16.vlgmr.msra.gmra.mxu3 %v1183_v7 }
 0x373   :  { %v1078_v9 = vsel %vm1074_vm5, %v2596_v46, %v2597_v8  ;;  %1828 = vmatpush.msra.mxu0 %v2676_v35 }
 0x374   :  { %v1190_v11 = vpack.c.bf16 %v1078_v9, %v1077_v18  ;;  %v2580_v12 = vpop.permute.xlu1 %2579  ;;  %v2630_v53 = vpop.permute.xlu2 %2629 }
 0x375   :  { %v2582_v23 = vunpack.i.h.bf16 %v2580_v12  ;;  %v2581_v26 = vunpack.i.l.bf16 %v2580_v12  ;;  %1829 = vmatpush.msra.mxu0 %v2677_v48  ;;  %v2632_v63 = vunpack.i.h.bf16 %v2630_v53  ;;  %v2631_v14 = vunpack.i.l.bf16 %v2630_v53  ;;  %v1638_v48 = vpop.f32.mrf.mxu3 }
 0x376   :  { %1680 = vmatmul.bf16.gmra.mxu1 %v1190_v11 }
 0x377   :  { %v1052_v39 = vsel %vm1049_vm6, %v2581_v26, %v2582_v23  ;;  %1830 = vmatpush.msra.mxu0 %v2679_v38  ;;  %v1171_v16 = vsel %vm1074_vm5, %v2631_v14, %v2632_v63 }
 0x378   :  { %v2600_v27 = vpop.permute.xlu0 %2599  ;;  %v1189_v17 = vpack.c.bf16 %v1053_v40, %v1052_v39 }
 0x379   :  { %v2602_v31 = vunpack.i.h.bf16 %v2600_v27  ;;  %v2601_v34 = vunpack.i.l.bf16 %v2600_v27  ;;  %1831 = vmatpush.msra.mxu0 %v2681_v52 }
 0x37a   :  { %1661 = vmatmul.bf16.gmra.mxu0 %v1189_v17 }
 0x37b   :  { %v1101_v22 = vsel %vm1049_vm6, %v2601_v34, %v2602_v31  ;;  %1832 = vmatpush.msra.mxu0 %v2683_v32 }
 0x37c   :  { %v2605_v15 = vpop.permute.xlu1 %2604  ;;  %v2645_v46 = vpop.permute.xlu2 %2644 }
 0x37d   :  { %v2607_v43 = vunpack.i.h.bf16 %v2605_v15  ;;  %v2606_v44 = vunpack.i.l.bf16 %v2605_v15  ;;  %1833 = vmatpush.msra.mxu0 %v2685_v10  ;;  %v2647_v11 = vunpack.i.h.bf16 %v2645_v46  ;;  %v2646_v12 = vunpack.i.l.bf16 %v2645_v46 }
 0x37f   :  { %v1102_v45 = vsel %vm1049_vm6, %v2606_v44, %v2607_v43  ;;  %1834 = vmatpush.msra.mxu0 %v2686_v62  ;;  %v1150_v39 = vsel %vm1049_vm6, %v2646_v12, %v2647_v11 }
 0x380   :  { %v2620_v36 = vpop.permute.xlu0 %2619  ;;  %v1192_v37 = vpack.c.bf16 %v1102_v45, %v1101_v22 }
 0x381   :  { %v2622_v0 = vunpack.i.h.bf16 %v2620_v36  ;;  %v2621_v2 = vunpack.i.l.bf16 %v2620_v36  ;;  %1835 = vmatpush.msra.mxu0 %v2687_v3 }
 0x382   :  { %1718 = vmatmul.bf16.gmra.mxu3 %v1192_v37  ;;  %v1640_v37 = vpop.f32.mrf.mxu3 }
 0x383   :  { %1836 = vmatpush.msra.mxu0 %v2678_v49  ;;  %v1123_v55 = vsel %vm1074_vm5, %v2621_v2, %v2622_v0 }
 0x384   :  { %v2610_v28 = vpop.permute.xlu1 %2609  ;;  %v2660_v40 = vpop.permute.xlu2 %2659 }
 0x385   :  { %v2612_v29 = vunpack.i.h.bf16 %v2610_v28  ;;  %v2611_v56 = vunpack.i.l.bf16 %v2610_v28  ;;  %1837 = vmatpush.msra.mxu0 %v2680_v1  ;;  %v2662_v31 = vunpack.i.h.bf16 %v2660_v40  ;;  %v2661_v34 = vunpack.i.l.bf16 %v2660_v40  ;;  %v1695_v1 = vpop.f32.mrf.mxu2 }
 0x386   :  { %1751 = vmatmul.bf16.vlgmr.msrb.gmra.mxu1 %v1185_v21 }
 0x387   :  { %v1147_v59 = vsel %vm1049_vm6, %v2611_v56, %v2612_v29  ;;  %1838 = vmatpush.msra.mxu0 %v2682_v54  ;;  %v1173_v36 = vsel %vm1074_vm5, %v2661_v34, %v2662_v31 }
 0x388   :  { %v2635_v60 = vpop.permute.xlu0 %2634  ;;  %v1186_v58 = vpack.c.bf16 %v1148_v57, %v1147_v59 }
 0x389   :  { %v2637_v21 = vunpack.i.h.bf16 %v2635_v60  ;;  %v2636_v61 = vunpack.i.l.bf16 %v2635_v60  ;;  %1839 = vmatpush.msra.mxu0 %v2684_v13 }
 0x38a   :  { %1770 = vmatmul.bf16.vlgmr.msrb.gmra.mxu2 %v1186_v58  ;;  %v1643_v49 = vpop.f32.mrf.mxu3 }
 0x38b   :  { %v1172_v6 = vsel %vm1074_vm5, %v2636_v61, %v2637_v21 }
 0x38c   :  { %v2625_v4 = vpop.permute.xlu1 %2624  ;;  %v1187_v33 = vpack.c.bf16 %v1172_v6, %v1171_v16 }
 0x38d   :  { %v2627_v7 = vunpack.i.h.bf16 %v2625_v4  ;;  %v2626_v8 = vunpack.i.l.bf16 %v2625_v4  ;;  %v1697_v53 = vpop.f32.mrf.mxu2 }
 0x38f   :  { %v1124_v18 = vsel %vm1074_vm5, %v2626_v8, %v2627_v7 }
 0x390   :  { %v2650_v9 = vpop.permute.xlu0 %2649  ;;  %v1184_v5 = vpack.c.bf16 %v1124_v18, %v1123_v55 }
 0x391   :  { %v2652_v30 = vunpack.i.h.bf16 %v2650_v9  ;;  %v2651_v15 = vunpack.i.l.bf16 %v2650_v9 }
 0x392   :  { %1732 = vmatmul.bf16.vlgmr.msrb.gmra.mxu0 %v1184_v5  ;;  %1789 = vmatmul.bf16.vlgmr.msrb.gmra.mxu3 %v1187_v33  ;;  %v1645_v51 = vpop.f32.mrf.mxu3 }
 0x393   :  { %v1125_v19 = vsel %vm1074_vm5, %v2651_v15, %v2652_v30 }
 0x394   :  { %v2640_v20 = vpop.permute.xlu1 %2639 }
 0x395   :  { %v2642_v23 = vunpack.i.h.bf16 %v2640_v20  ;;  %v2641_v26 = vunpack.i.l.bf16 %v2640_v20  ;;  %v1700_v56 = vpop.f32.mrf.mxu2 }
 0x396   :  { %1756 = vmatmul.bf16.gmra.mxu1 %v1194_v47 }
 0x397   :  { %v1149_v27 = vsel %vm1049_vm6, %v2641_v26, %v2642_v23 }
 0x398   :  { %v2665_v24 = vpop.permute.xlu0 %2664  ;;  %v1195_v17 = vpack.c.bf16 %v1150_v39, %v1149_v27 }
 0x399   :  { %v2667_v25 = vunpack.i.h.bf16 %v2665_v24  ;;  %v2666_v42 = vunpack.i.l.bf16 %v2665_v24 }
 0x39a   :  { %1775 = vmatmul.bf16.gmra.mxu2 %v1195_v17 }
 0x39b   :  { %v1174_v41 = vsel %vm1074_vm5, %v2666_v42, %v2667_v25 }
 0x39c   :  { %v2655_v43 = vpop.permute.xlu1 %2654  ;;  %v1196_v45 = vpack.c.bf16 %v1174_v41, %v1173_v36 }
 0x39d   :  { %v2657_v44 = vunpack.i.h.bf16 %v2655_v43  ;;  %v2656_v35 = vunpack.i.l.bf16 %v2655_v43  ;;  %v1702_v59 = vpop.f32.mrf.mxu2 }
 0x39f   :  { %v1126_v47 = vsel %vm1074_vm5, %v2656_v35, %v2657_v44 }
 0x3a0   :  { %v1193_v22 = vpack.c.bf16 %v1126_v47, %v1125_v19 }
 0x3a2   :  { %1737 = vmatmul.bf16.gmra.mxu0 %v1193_v22  ;;  %1794 = vmatmul.bf16.gmra.mxu3 %v1196_v45 }
 0x3cf   :  { %v1676_v38 = vpop.f32.mrf.mxu1 }
 0x3d7   :  { %v1678_v52 = vpop.f32.mrf.mxu1 }
 0x3e7   :  { %v1657_v50 = vpop.f32.mrf.mxu0 }
 0x3e8   :  { %v1658_v14 = vadd.f32 %v1657_v50, %v1638_v48 }
 0x3ea   :  { %v1677_v2 = vadd.f32 %v1676_v38, %v1658_v14 }
 0x3ec   :  { %v1696_v16 = vadd.f32 %v1695_v1, %v1677_v2 }
 0x3ef   :  { %v1659_v28 = vpop.f32.mrf.mxu0 }
 0x3f0   :  { %v1660_v62 = vadd.f32 %v1659_v28, %v1640_v37 }
 0x3f2   :  { %v1679_v0 = vadd.f32 %v1678_v52, %v1660_v62 }
 0x3f3   :  { %v1681_v29 = vpop.f32.mrf.mxu1 }
 0x3f4   :  { %v1698_v7 = vadd.f32 %v1697_v53, %v1679_v0 }
 0x3f5   :  { %v1714_v54 = vpop.f32.mrf.mxu3 }
 0x3f6   :  { %v1715_v9 = vadd.f32 %v1714_v54, %v1696_v16 }
 0x3f7   :  { %v1662_v32 = vpop.f32.mrf.mxu0 }
 0x3f8   :  { %v1663_v3 = vadd.f32 %v1662_v32, %v1643_v49 }
 0x3fa   :  { %v1682_v55 = vadd.f32 %v1681_v29, %v1663_v3 }
 0x3fb   :  { %v1683_v57 = vpop.f32.mrf.mxu1 }
 0x3fc   :  { %v1701_v11 = vadd.f32 %v1700_v56, %v1682_v55 }
 0x3fd   :  { %v1716_v13 = vpop.f32.mrf.mxu3 }
 0x3fe   :  { %v1717_v18 = vadd.f32 %v1716_v13, %v1698_v7 }
 0x3ff   :  { %v1664_v10 = vpop.f32.mrf.mxu0 }
 0x400   :  { %v1665_v5 = vadd.f32 %v1664_v10, %v1645_v51 }
 0x402   :  { %v1684_v39 = vadd.f32 %v1683_v57, %v1665_v5  ;;  %v1800_v5 = vld [vmem:[%s3493_s5] sm:$0x1] }
 0x403   :  { %v1752_v58 = vpop.f32.mrf.mxu1 }
 0x404   :  { %v1703_v34 = vadd.f32 %v1702_v59, %v1684_v39 }
 0x405   :  { %v1719_v60 = vpop.f32.mrf.mxu3 }
 0x406   :  { %v1720_v23 = vadd.f32 %v1719_v60, %v1701_v11 }
 0x40b   :  { %v1754_v4 = vpop.f32.mrf.mxu1 }
 0x40d   :  { %v1721_v21 = vpop.f32.mrf.mxu3  ;;  %v1771_v61 = vpop.f32.mrf.mxu2 }
 0x40e   :  { %v1722_v44 = vadd.f32 %v1721_v21, %v1703_v34 }
 0x40f   :  { %v1733_v63 = vpop.f32.mrf.mxu0 }
 0x410   :  { %v1734_v12 = vadd.f32 %v1733_v63, %v1715_v9 }
 0x412   :  { %v1753_v40 = vadd.f32 %v1752_v58, %v1734_v12 }
 0x413   :  { %v1757_v24 = vpop.f32.mrf.mxu1 }
 0x414   :  { %v1772_v30 = vadd.f32 %v1771_v61, %v1753_v40 }
 0x415   :  { %v1790_v6 = vpop.f32.mrf.mxu3  ;;  %v1773_v8 = vpop.f32.mrf.mxu2 }
 0x416   :  { %v1791_v19 = vadd.f32 %v1790_v6, %v1772_v30 }
 0x417   :  { %v1735_v46 = vpop.f32.mrf.mxu0 }
 0x418   :  { %v1736_v33 = vadd.f32 %v1735_v46, %v1717_v18  ;;  %v1811_v49 = vmul.f32 %v1791_v19, %v1791_v19 }
 0x41a   :  { %v1755_v26 = vadd.f32 %v1754_v4, %v1736_v33 }
 0x41b   :  { %v1759_v22 = vpop.f32.mrf.mxu1 }
 0x41c   :  { %v1774_v42 = vadd.f32 %v1773_v8, %v1755_v26 }
 0x41d   :  { %v1792_v20 = vpop.f32.mrf.mxu3  ;;  %v1776_v25 = vpop.f32.mrf.mxu2 }
 0x41e   :  { %v1793_v35 = vadd.f32 %v1792_v20, %v1774_v42 }
 0x41f   :  { %v1738_v27 = vpop.f32.mrf.mxu0 }
 0x420   :  { %v1739_v17 = vadd.f32 %v1738_v27, %v1720_v23  ;;  %v1812_v45 = vmul.f32 %v1793_v35, %v1793_v35  ;;  %v1802_v38 = vadd.f32 %v1793_v35, %v1791_v19  ;;  %v1801_v23 = vld [vmem:[%s3494_s6] sm:$0x1] }
 0x422   :  { %v1758_v31 = vadd.f32 %v1757_v24, %v1739_v17  ;;  %v1815_v52 = vadd.f32 %v1812_v45, %v1811_v49 }
 0x424   :  { %v1777_v15 = vadd.f32 %v1776_v25, %v1758_v31 }
 0x425   :  { %v1795_v43 = vpop.f32.mrf.mxu3  ;;  %v1778_v37 = vpop.f32.mrf.mxu2 }
 0x426   :  { %v1796_v47 = vadd.f32 %v1795_v43, %v1777_v15 }
 0x427   :  { %v1740_v41 = vpop.f32.mrf.mxu0 }
 0x428   :  { %v1741_v36 = vadd.f32 %v1740_v41, %v1722_v44  ;;  %v1813_v1 = vmul.f32 %v1796_v47, %v1796_v47  ;;  %v1803_v53 = vadd.f32 %v1802_v38, %v1796_v47 }
 0x42a   :  { %v1760_v48 = vadd.f32 %v1759_v22, %v1741_v36  ;;  %v1816_v54 = vadd.f32 %v1815_v52, %v1813_v1 }
 0x42c   :  { %v1779_v50 = vadd.f32 %v1778_v37, %v1760_v48 }
 0x42d   :  { %v1797_v51 = vpop.f32.mrf.mxu3 }
 0x42e   :  { %v1798_v28 = vadd.f32 %v1797_v51, %v1779_v50 }
 0x430   :  { %v1804_v29 = vadd.f32 %v1803_v53, %v1798_v28  ;;  %v1814_v56 = vmul.f32 %v1798_v28, %v1798_v28 }
 0x432   :  { %v1805_v32 = vrot.slane %v1804_v29, 4  ;;  %v1817_v13 = vadd.f32 %v1816_v54, %v1814_v56 }
 0x434   :  { %v1806_v57 = vadd.f32 %v1805_v32, %v1804_v29  ;;  %v1818_v59 = vrot.slane %v1817_v13, 4 }
 0x436   :  { %v1807_v60 = vrot.slane %v1806_v57, 2  ;;  %v1819_v10 = vadd.f32 %v1818_v59, %v1817_v13 }
 0x438   :  { %v1808_v58 = vadd.f32 %v1807_v60, %v1806_v57  ;;  %v1820_v21 = vrot.slane %v1819_v10, 2 }
 0x43a   :  { %v1809_v61 = vrot.slane %v1808_v58, 1  ;;  %v1821_v62 = vadd.f32 %v1820_v21, %v1819_v10 }
 0x43c   :  { %v1810_v63 = vadd.f32 %v1809_v61, %v1808_v58  ;;  %v1822_v14 = vrot.slane %v1821_v62, 1 }
 0x43e   :  { %1840 = vmatmul.f32.vlgmr.msra.gmra.mxu0 %v1810_v63  ;;  %v1823_v0 = vadd.f32 %v1822_v14, %v1821_v62 }
 0x440   :  { %1861 = vmatmul.f32.vlgmr.msra.gmra.mxu1 %v1823_v0 }
 0x4bb   :  { %v1841_v2 = vpop.f32.mrf.mxu0 }
 0x4bc   :  { %v1844_v3 = vmul.f32 0.001953125, %v1841_v2 }
 0x4bd   :  { %v1862_v4 = vpop.f32.mrf.mxu1 }
 0x4be   :  { %v1866_v6 = vmul.f32 %v1844_v3, %v1844_v3  ;;  %v1865_v7 = vmul.f32 0.001953125, %v1862_v4 }
 0x4c0   :  { %v1867_v8 = vsub.f32 %v1865_v7, %v1866_v6 }
 0x4c2   :  { %v1868_v46 = vadd.f32 1e-05, %v1867_v8 }
 0x4c4   :  { %2670 = vrsqrt.f32 %v1868_v46  ;;  %vm1875_vm8 = vweird.f32 %v1868_v46 }
 0x4ca   :  { %v2671_v16 = vpop.eup %2670 }
 0x4cb   :  { %v1870_v55 = vmul.f32 %v2671_v16, %v1868_v46  ;;  %vm1876_vm7 = vweird.f32 %v2671_v16 }
 0x4cc   :  { %vm1877_vm9 = vmor %vm1875_vm8, %vm1876_vm7 }
 0x4cd   :  { %v1871_v18 = vmul.f32 %v2671_v16, %v1870_v55 }
 0x4cf   :  { %v1872_v9 = vmul.f32 0.5, %v1871_v18 }
 0x4d1   :  { %v1873_v33 = vsub.f32 1.5, %v1872_v9 }
 0x4d3   :  { %v1874_v11 = vmul.f32 %v2671_v16, %v1873_v33 }
 0x4d5   :  { %v1878_v12 = vsel %vm1877_vm9, %v2671_v16, %v1874_v11 }
 0x4d6   :  { %v1879_v20 = vmul.f32 %v1878_v12, %v1800_v5 }
 0x4d8   :  { %v1880_v26 = vmul.f32 %v1879_v20, %v1844_v3  ;;  %v1883_v24 = vperm.slane %v1879_v20, 0 }
 0x4da   :  { %v1881_v27 = vsub.f32 %v1801_v23, %v1880_v26  ;;  %v1885_v39 = vmul.f32 %v1883_v24, %v1791_v19  ;;  %v1886_v40 = vmul.f32 %v1883_v24, %v1793_v35  ;;  %v1887_v17 = vmul.f32 %v1883_v24, %v1796_v47 }
 0x4db   :  { %v1888_v25 = vmul.f32 %v1883_v24, %v1798_v28 }
 0x4dc   :  { %v1890_v42 = vperm.slane %v1881_v27, 0 }
 0x4de   :  { %v1892_v31 = vadd.f32 %v1890_v42, %v1885_v39  ;;  %v1893_v34 = vadd.f32 %v1890_v42, %v1886_v40  ;;  %v1894_v30 = vadd.f32 %v1890_v42, %v1887_v17  ;;  %v1895_v15 = vadd.f32 %v1890_v42, %v1888_v25 }
 0x4e0   :  { %v1896_v43 = vmax.f32 %v1892_v31, 0.0  ;;  %v1897_v44 = vmax.f32 %v1893_v34, 0.0  ;;  %v1898_v41 = vmax.f32 %v1894_v30, 0.0  ;;  %v1899_v36 = vmax.f32 %v1895_v15, 0.0 }
 0x4e2   :  { %1900 = vst [vmem:[%s3495_s8] sm:$0xff] %v1896_v43 }
 0x4e3   :  { %1901 = vst [vmem:[%s3495_s8 + $0x8] sm:$0xff] %v1897_v44 }
 0x4e4   :  { %1902 = vst [vmem:[%s3495_s8 + $0x10] sm:$0xff] %v1898_v41 }
 0x4e5   :  { %1903 = vst [vmem:[%s3495_s8 + $0x18] sm:$0xff] %v1899_v36 }

</bundles_post_ra>
